<compile_context>
chip_gen: v5e
topology: v5e:2x2
jax: 0.10.0
libtpu: 0.0.40
codegen_flags: <defaults>
</compile_context>

<pallas_src>
import functools

import jax
import jax.numpy as jnp
from jax.experimental import pallas as pl
from jax.experimental.pallas import tpu as pltpu


# ------------------------------ Pallas kernel -------------------------------

def _coordconv_kernel(x_ref, w_ref, cb_ref, o_ref, lhs_ref, *, TH, W, Cin):
    """Fused 3x3 conv (scale-folded) + bias + ReLU for one (batch, row-tile).

    x_ref  : [TH+2, W+2, Cin]  bf16  zero-padded input rows (2-row halo).
    w_ref  : [9*Cin, Cout]     bf16  conv weights * BN scale, tap-major rows
                                     ((dy*3+dx)*Cin + c).
    cb_ref : [TH*W, Cout]      f32   coord-channel conv * BN scale + BN bias.
    o_ref  : [TH*W, Cout]      f32   output (NHWC rows, flattened spatially).
    lhs_ref: [TH*W, 9*Cin]     bf16  VMEM im2col scratch (fully rewritten each step).
    """
    # Build the im2col lhs in VMEM: 9 shifted windows concatenated along K.
    for dy in range(3):
        for dx in range(3):
            tap = x_ref[dy:dy + TH, dx:dx + W, :].reshape(TH * W, Cin)
            t = dy * 3 + dx
            lhs_ref[:, t * Cin:(t + 1) * Cin] = tap
    # One deep MXU matmul: bf16 x bf16 -> f32 accumulate.
    acc = jnp.dot(lhs_ref[...], w_ref[...], preferred_element_type=jnp.float32)
    # Epilogue: ReLU(data_conv*scale + (coord_conv*scale + bias)).
    o_ref[...] = jnp.maximum(acc + cb_ref[...], 0.0)


# --------------------------------- forward ----------------------------------

def coordconv_forward(params, x_nchw):
    """CoordConv forward. x_nchw: [B, Cin, H, W] float32 -> [B, Cout, H, W]."""
    B, Cin, H, W = x_nchw.shape
    w = params['w']          # [3, 3, Cin+2, Cout]   (data channels, then x, y coords)
    scale = params['scale']  # [Cout]  folded BN scale
    bias = params['bias']    # [Cout]  folded BN bias
    Cout = w.shape[-1]
    Wp = W + 2

    # --- row-tile size: aim for M = TH*W ~ 128 output rows per MXU dot.
    #     (For production resolutions, size TH against vmem_limit_bytes.)
    TH = H
    for cand in range(min(H, max(1, 128 // W)), 0, -1):
        if H % cand == 0 and (cand * W) % 8 == 0:
            TH = cand
            break
    n_tiles = H // TH

    # --- fold BN scale into data-channel weights (exact), cast to bf16 for MXU.
    w_data = (w[:, :, :Cin, :] * scale).reshape(9 * Cin, Cout).astype(jnp.bfloat16)
    w_coord = w[:, :, Cin:, :]                                    # [3,3,2,Cout] f32

    # --- coord-channel contribution (batch independent, tiny), precomputed in
    #     f32 and pre-folded with BN scale/bias into one additive bias map.
    xs = jnp.linspace(-1.0, 1.0, W)
    ys = jnp.linspace(-1.0, 1.0, H)
    coord = jnp.stack([jnp.broadcast_to(xs[None, :], (H, W)),     # channel 0: x
                       jnp.broadcast_to(ys[:, None], (H, W))],    # channel 1: y
                      axis=-1)                                    # [H, W, 2]
    cpad = jnp.pad(coord, ((1, 1), (1, 1), (0, 0)))               # conv zero padding
    cc = jnp.zeros((H, W, Cout), jnp.float32)
    for dy in range(3):
        for dx in range(3):
            cc = cc + jnp.einsum('hwc,cn->hwn',
                                 cpad[dy:dy + H, dx:dx + W, :], w_coord[dy, dx])
    cb = (cc * scale + bias).reshape(H * W, Cout).astype(jnp.float32)

    # --- data path: NHWC bf16, 1-pixel zero halo, host-side row tiles with a
    #     duplicated 2-row halo so Blocked BlockSpecs need no overlap.
    x_nhwc = jnp.transpose(x_nchw, (0, 2, 3, 1)).astype(jnp.bfloat16)
    xp = jnp.pad(x_nhwc, ((0, 0), (1, 1), (1, 1), (0, 0)))        # [B, H+2, Wp, Cin]
    x_tiles = jnp.stack([xp[:, t * TH:t * TH + TH + 2]
                         for t in range(n_tiles)], axis=1)        # [B, nT, TH+2, Wp, Cin]

    kernel = functools.partial(_coordconv_kernel, TH=TH, W=W, Cin=Cin)
    flops = 2 * B * H * W * (9 * Cin) * Cout
    bytes_accessed = int(x_tiles.size * 2 + w_data.size * 2
                         + cb.size * 4 + B * H * W * Cout * 4)

    out = pl.pallas_call(
        kernel,
        out_shape=jax.ShapeDtypeStruct((B, H * W, Cout), jnp.float32),
        grid=(B, n_tiles),
        in_specs=[
            pl.BlockSpec((None, None, TH + 2, Wp, Cin),
                         lambda b, t: (b, t, 0, 0, 0)),
            pl.BlockSpec((9 * Cin, Cout), lambda b, t: (0, 0)),
            pl.BlockSpec((TH * W, Cout), lambda b, t: (t, 0)),
        ],
        out_specs=pl.BlockSpec((None, TH * W, Cout), lambda b, t: (b, t, 0)),
        scratch_shapes=[pltpu.VMEM((TH * W, 9 * Cin), jnp.bfloat16)],
        compiler_params=pltpu.CompilerParams(
            dimension_semantics=("parallel", "parallel"),
            vmem_limit_bytes=32 * 1024 * 1024),
        cost_estimate=pl.CostEstimate(flops=flops, transcendentals=0,
                                      bytes_accessed=bytes_accessed),
    )(x_tiles, w_data, cb)

    # Compact NHWC -> NCHW (single fused XLA transpose of the exact output size).
    return jnp.transpose(out.reshape(B, H, W, Cout), (0, 3, 1, 2))


# ------------------------------ pure-JAX reference --------------------------

def coordconv_reference(params, x_nchw):
    B, Cin, H, W = x_nchw.shape
    w, scale, bias = params['w'], params['scale'], params['bias']
    xs = jnp.linspace(-1.0, 1.0, W)
    ys = jnp.linspace(-1.0, 1.0, H)
    coord = jnp.stack([jnp.broadcast_to(xs[None, :], (H, W)),
                       jnp.broadcast_to(ys[:, None], (H, W))], axis=-1)
    coord = jnp.broadcast_to(coord[None], (B, H, W, 2))
    xin = jnp.concatenate([jnp.transpose(x_nchw, (0, 2, 3, 1)), coord], axis=-1)
    xp = jnp.pad(xin, ((0, 0), (1, 1), (1, 1), (0, 0)))
    out = jnp.zeros((B, H, W, w.shape[-1]), jnp.float32)
    for dy in range(3):
        for dx in range(3):
            out = out + jnp.einsum('bhwc,cn->bhwn',
                                   xp[:, dy:dy + H, dx:dx + W, :], w[dy, dx],
                                   precision=jax.lax.Precision.HIGHEST)
    out = jnp.maximum(out * scale + bias, 0.0)
    return jnp.transpose(out, (0, 3, 1, 2))


# -------------------------------- parameters --------------------------------

def init_params(key, in_channels, out_channels):
    k1, k2, k3, k4, k5 = jax.random.split(key, 5)
    cin_t = in_channels + 2                     # + coord-x, coord-y channels
    fan_in = cin_t * 9
    w = jax.random.normal(k1, (3, 3, cin_t, out_channels)) / jnp.sqrt(float(fan_in))
    gamma = jax.random.uniform(k2, (out_channels,), minval=0.5, maxval=1.5)
    beta = jax.random.normal(k3, (out_channels,)) * 0.1
    mean = jax.random.normal(k4, (out_channels,)) * 0.1
    var = jax.random.uniform(k5, (out_channels,), minval=0.5, maxval=1.5)
    scale = gamma / jnp.sqrt(var + 1e-5)        # inference-mode BatchNorm fold
    bias = beta - mean * scale
    return {'w': w.astype(jnp.float32),
            'scale': scale.astype(jnp.float32),
            'bias': bias.astype(jnp.float32)}


# ----------------------------------- main ------------------------------------

if __name__ == "__main__":
    B, Cin, H, W = 2, 8, 16, 16
    Cout = 16

    key = jax.random.PRNGKey(0)
    kp, kx = jax.random.split(key)
    params = init_params(kp, Cin, Cout)
    x = jax.random.normal(kx, (B, Cin, H, W), dtype=jnp.float32)

    fwd = jax.jit(coordconv_forward)
    out = jax.block_until_ready(fwd(params, x))
    assert out.shape == (B, Cout, H, W), out.shape

    # bf16 MXU operands (f32 accumulate) vs. f32 HIGHEST reference: errors stay
    # well under this tolerance for these magnitudes.
    ref = coordconv_reference(params, x)
    err = float(jnp.max(jnp.abs(out - ref)))
    assert err < 5e-2, f"max abs err vs reference: {err}"

    print("KERNEL_OK")
</pallas_src>

<mosaic_0001>
module attributes {stable_mosaic.version = 11 : i64} {
  func.func @_coordconv_kernel(%arg0: i32, %arg1: i32, %arg2: memref<1x1x10x18x8xbf16, #tpu.memory_space<vmem>>, %arg3: memref<72x16xbf16, #tpu.memory_space<vmem>>, %arg4: memref<128x16xf32, #tpu.memory_space<vmem>>, %arg5: memref<1x128x16xf32, #tpu.memory_space<vmem>>, %arg6: memref<128x72xbf16, #tpu.memory_space<vmem>>) attributes {dimension_semantics = [#tpu.dimension_semantics<parallel>, #tpu.dimension_semantics<parallel>], iteration_bounds = array<i64: 2, 2>, scalar_prefetch = 0 : i64, scratch_operands = 1 : i64, tpu.core_type = #tpu.core_type<tc>, window_params = [{transform_indices = @transform_0, window_bounds = array<i64: 1, 1, 10, 18, 8>}, {pipeline_mode = #tpu.pipeline_mode<synchronous>, transform_indices = @transform_1, window_bounds = array<i64: 72, 16>}, {transform_indices = @transform_2, window_bounds = array<i64: 128, 16>}, {transform_indices = @transform_3, window_bounds = array<i64: 1, 128, 16>}]} {
    %c0 = arith.constant 0 : index
    %c0_0 = arith.constant 0 : index
    %c0_1 = arith.constant 0 : index
    %c0_2 = arith.constant 0 : index
    %c0_3 = arith.constant 0 : index
    %0 = vector.load %arg2[%c0, %c0_0, %c0_1, %c0_2, %c0_3] : memref<1x1x10x18x8xbf16, #tpu.memory_space<vmem>>, vector<1x1x8x16x8xbf16>
    %1 = vector.shape_cast %0 : vector<1x1x8x16x8xbf16> to vector<8x16x8xbf16>
    %2 = vector.shape_cast %1 : vector<8x16x8xbf16> to vector<128x8xbf16>
    %c0_4 = arith.constant 0 : index
    %c0_5 = arith.constant 0 : index
    %3 = vector.load %arg6[%c0_4, %c0_5] : memref<128x72xbf16, #tpu.memory_space<vmem>>, vector<128x8xbf16>
    tpu.vector_store %arg6[%c0_4, %c0_5], %2 {strides = array<i32>} : memref<128x72xbf16, #tpu.memory_space<vmem>>, vector<128x8xbf16>,
    %c0_6 = arith.constant 0 : index
    %c0_7 = arith.constant 0 : index
    %c0_8 = arith.constant 0 : index
    %c1 = arith.constant 1 : index
    %c0_9 = arith.constant 0 : index
    %4 = vector.load %arg2[%c0_6, %c0_7, %c0_8, %c1, %c0_9] : memref<1x1x10x18x8xbf16, #tpu.memory_space<vmem>>, vector<1x1x8x16x8xbf16>
    %5 = vector.shape_cast %4 : vector<1x1x8x16x8xbf16> to vector<8x16x8xbf16>
    %6 = vector.shape_cast %5 : vector<8x16x8xbf16> to vector<128x8xbf16>
    %c0_10 = arith.constant 0 : index
    %c8 = arith.constant 8 : index
    %7 = vector.load %arg6[%c0_10, %c8] : memref<128x72xbf16, #tpu.memory_space<vmem>>, vector<128x8xbf16>
    tpu.vector_store %arg6[%c0_10, %c8], %6 {strides = array<i32>} : memref<128x72xbf16, #tpu.memory_space<vmem>>, vector<128x8xbf16>,
    %c0_11 = arith.constant 0 : index
    %c0_12 = arith.constant 0 : index
    %c0_13 = arith.constant 0 : index
    %c2 = arith.constant 2 : index
    %c0_14 = arith.constant 0 : index
    %8 = vector.load %arg2[%c0_11, %c0_12, %c0_13, %c2, %c0_14] : memref<1x1x10x18x8xbf16, #tpu.memory_space<vmem>>, vector<1x1x8x16x8xbf16>
    %9 = vector.shape_cast %8 : vector<1x1x8x16x8xbf16> to vector<8x16x8xbf16>
    %10 = vector.shape_cast %9 : vector<8x16x8xbf16> to vector<128x8xbf16>
    %c0_15 = arith.constant 0 : index
    %c16 = arith.constant 16 : index
    %11 = vector.load %arg6[%c0_15, %c16] : memref<128x72xbf16, #tpu.memory_space<vmem>>, vector<128x8xbf16>
    tpu.vector_store %arg6[%c0_15, %c16], %10 {strides = array<i32>} : memref<128x72xbf16, #tpu.memory_space<vmem>>, vector<128x8xbf16>,
    %c0_16 = arith.constant 0 : index
    %c0_17 = arith.constant 0 : index
    %c1_18 = arith.constant 1 : index
    %c0_19 = arith.constant 0 : index
    %c0_20 = arith.constant 0 : index
    %12 = vector.load %arg2[%c0_16, %c0_17, %c1_18, %c0_19, %c0_20] : memref<1x1x10x18x8xbf16, #tpu.memory_space<vmem>>, vector<1x1x8x16x8xbf16>
    %13 = vector.shape_cast %12 : vector<1x1x8x16x8xbf16> to vector<8x16x8xbf16>
    %14 = vector.shape_cast %13 : vector<8x16x8xbf16> to vector<128x8xbf16>
    %c0_21 = arith.constant 0 : index
    %c24 = arith.constant 24 : index
    %15 = vector.load %arg6[%c0_21, %c24] : memref<128x72xbf16, #tpu.memory_space<vmem>>, vector<128x8xbf16>
    tpu.vector_store %arg6[%c0_21, %c24], %14 {strides = array<i32>} : memref<128x72xbf16, #tpu.memory_space<vmem>>, vector<128x8xbf16>,
    %c0_22 = arith.constant 0 : index
    %c0_23 = arith.constant 0 : index
    %c1_24 = arith.constant 1 : index
    %c1_25 = arith.constant 1 : index
    %c0_26 = arith.constant 0 : index
    %16 = vector.load %arg2[%c0_22, %c0_23, %c1_24, %c1_25, %c0_26] : memref<1x1x10x18x8xbf16, #tpu.memory_space<vmem>>, vector<1x1x8x16x8xbf16>
    %17 = vector.shape_cast %16 : vector<1x1x8x16x8xbf16> to vector<8x16x8xbf16>
    %18 = vector.shape_cast %17 : vector<8x16x8xbf16> to vector<128x8xbf16>
    %c0_27 = arith.constant 0 : index
    %c32 = arith.constant 32 : index
    %19 = vector.load %arg6[%c0_27, %c32] : memref<128x72xbf16, #tpu.memory_space<vmem>>, vector<128x8xbf16>
    tpu.vector_store %arg6[%c0_27, %c32], %18 {strides = array<i32>} : memref<128x72xbf16, #tpu.memory_space<vmem>>, vector<128x8xbf16>,
    %c0_28 = arith.constant 0 : index
    %c0_29 = arith.constant 0 : index
    %c1_30 = arith.constant 1 : index
    %c2_31 = arith.constant 2 : index
    %c0_32 = arith.constant 0 : index
    %20 = vector.load %arg2[%c0_28, %c0_29, %c1_30, %c2_31, %c0_32] : memref<1x1x10x18x8xbf16, #tpu.memory_space<vmem>>, vector<1x1x8x16x8xbf16>
    %21 = vector.shape_cast %20 : vector<1x1x8x16x8xbf16> to vector<8x16x8xbf16>
    %22 = vector.shape_cast %21 : vector<8x16x8xbf16> to vector<128x8xbf16>
    %c0_33 = arith.constant 0 : index
    %c40 = arith.constant 40 : index
    %23 = vector.load %arg6[%c0_33, %c40] : memref<128x72xbf16, #tpu.memory_space<vmem>>, vector<128x8xbf16>
    tpu.vector_store %arg6[%c0_33, %c40], %22 {strides = array<i32>} : memref<128x72xbf16, #tpu.memory_space<vmem>>, vector<128x8xbf16>,
    %c0_34 = arith.constant 0 : index
    %c0_35 = arith.constant 0 : index
    %c2_36 = arith.constant 2 : index
    %c0_37 = arith.constant 0 : index
    %c0_38 = arith.constant 0 : index
    %24 = vector.load %arg2[%c0_34, %c0_35, %c2_36, %c0_37, %c0_38] : memref<1x1x10x18x8xbf16, #tpu.memory_space<vmem>>, vector<1x1x8x16x8xbf16>
    %25 = vector.shape_cast %24 : vector<1x1x8x16x8xbf16> to vector<8x16x8xbf16>
    %26 = vector.shape_cast %25 : vector<8x16x8xbf16> to vector<128x8xbf16>
    %c0_39 = arith.constant 0 : index
    %c48 = arith.constant 48 : index
    %27 = vector.load %arg6[%c0_39, %c48] : memref<128x72xbf16, #tpu.memory_space<vmem>>, vector<128x8xbf16>
    tpu.vector_store %arg6[%c0_39, %c48], %26 {strides = array<i32>} : memref<128x72xbf16, #tpu.memory_space<vmem>>, vector<128x8xbf16>,
    %c0_40 = arith.constant 0 : index
    %c0_41 = arith.constant 0 : index
    %c2_42 = arith.constant 2 : index
    %c1_43 = arith.constant 1 : index
    %c0_44 = arith.constant 0 : index
    %28 = vector.load %arg2[%c0_40, %c0_41, %c2_42, %c1_43, %c0_44] : memref<1x1x10x18x8xbf16, #tpu.memory_space<vmem>>, vector<1x1x8x16x8xbf16>
    %29 = vector.shape_cast %28 : vector<1x1x8x16x8xbf16> to vector<8x16x8xbf16>
    %30 = vector.shape_cast %29 : vector<8x16x8xbf16> to vector<128x8xbf16>
    %c0_45 = arith.constant 0 : index
    %c56 = arith.constant 56 : index
    %31 = vector.load %arg6[%c0_45, %c56] : memref<128x72xbf16, #tpu.memory_space<vmem>>, vector<128x8xbf16>
    tpu.vector_store %arg6[%c0_45, %c56], %30 {strides = array<i32>} : memref<128x72xbf16, #tpu.memory_space<vmem>>, vector<128x8xbf16>,
    %c0_46 = arith.constant 0 : index
    %c0_47 = arith.constant 0 : index
    %c2_48 = arith.constant 2 : index
    %c2_49 = arith.constant 2 : index
    %c0_50 = arith.constant 0 : index
    %32 = vector.load %arg2[%c0_46, %c0_47, %c2_48, %c2_49, %c0_50] : memref<1x1x10x18x8xbf16, #tpu.memory_space<vmem>>, vector<1x1x8x16x8xbf16>
    %33 = vector.shape_cast %32 : vector<1x1x8x16x8xbf16> to vector<8x16x8xbf16>
    %34 = vector.shape_cast %33 : vector<8x16x8xbf16> to vector<128x8xbf16>
    %c0_51 = arith.constant 0 : index
    %c64 = arith.constant 64 : index
    %35 = vector.load %arg6[%c0_51, %c64] : memref<128x72xbf16, #tpu.memory_space<vmem>>, vector<128x8xbf16>
    tpu.vector_store %arg6[%c0_51, %c64], %34 {strides = array<i32>} : memref<128x72xbf16, #tpu.memory_space<vmem>>, vector<128x8xbf16>,
    %c0_52 = arith.constant 0 : index
    %c0_53 = arith.constant 0 : index
    %36 = vector.load %arg6[%c0_52, %c0_53] : memref<128x72xbf16, #tpu.memory_space<vmem>>, vector<128x72xbf16>
    %c0_54 = arith.constant 0 : index
    %c0_55 = arith.constant 0 : index
    %37 = vector.load %arg3[%c0_54, %c0_55] : memref<72x16xbf16, #tpu.memory_space<vmem>>, vector<72x16xbf16>
    %cst = arith.constant dense<0.000000e+00> : vector<128x16xf32>
    %38 = tpu.matmul %36, %37, %cst {dimension_numbers = #tpu.dot_dimension_numbers<[1], [0], [0], [1], [0, 0, 1, 1], [], []>} : vector<128x72xbf16>, vector<72x16xbf16>, vector<128x16xf32> -> vector<128x16xf32>
    %c0_56 = arith.constant 0 : index
    %c0_57 = arith.constant 0 : index
    %39 = vector.load %arg4[%c0_56, %c0_57] : memref<128x16xf32, #tpu.memory_space<vmem>>, vector<128x16xf32>
    %40 = arith.addf %38, %39 : vector<128x16xf32>
    %cst_58 = arith.constant 0.000000e+00 : f32
    %41 = vector.broadcast %cst_58 : f32 to vector<128x16xf32>
    %42 = arith.maximumf %40, %41 : vector<128x16xf32>
    %c0_59 = arith.constant 0 : index
    %c0_60 = arith.constant 0 : index
    %c0_61 = arith.constant 0 : index
    %43 = vector.load %arg5[%c0_59, %c0_60, %c0_61] : memref<1x128x16xf32, #tpu.memory_space<vmem>>, vector<1x128x16xf32>
    %44 = vector.shape_cast %43 : vector<1x128x16xf32> to vector<128x16xf32>
    %45 = vector.shape_cast %42 : vector<128x16xf32> to vector<1x128x16xf32>
    tpu.vector_store %arg5[%c0_59, %c0_60, %c0_61], %45 {strides = array<i32>} : memref<1x128x16xf32, #tpu.memory_space<vmem>>, vector<1x128x16xf32>,
    return
  }
  func.func @transform_0(%arg0: i32, %arg1: i32) -> (i32, i32, i32, i32, i32) {
    %c0_i32 = arith.constant 0 : i32
    %c0_i32_0 = arith.constant 0 : i32
    %c0_i32_1 = arith.constant 0 : i32
    %c0_i32_2 = arith.constant 0 : i32
    return %arg0, %arg1, %c0_i32, %c0_i32_0, %c0_i32_1 : i32, i32, i32, i32, i32
  }
  func.func @transform_1(%arg0: i32, %arg1: i32) -> (i32, i32) {
    %c0_i32 = arith.constant 0 : i32
    %c0_i32_0 = arith.constant 0 : i32
    %c0_i32_1 = arith.constant 0 : i32
    return %c0_i32, %c0_i32_0 : i32, i32
  }
  func.func @transform_2(%arg0: i32, %arg1: i32) -> (i32, i32) {
    %c0_i32 = arith.constant 0 : i32
    %c0_i32_0 = arith.constant 0 : i32
    return %arg1, %c0_i32 : i32, i32
  }
  func.func @transform_3(%arg0: i32, %arg1: i32) -> (i32, i32, i32) {
    %c0_i32 = arith.constant 0 : i32
    %c0_i32_0 = arith.constant 0 : i32
    return %arg0, %arg1, %c0_i32 : i32, i32, i32
  }
}

</mosaic_0001>

<bundles_post_ra>
// kernel: coordconv_forward.1
= control target key start
LH: loop header
LB: loop body
LE: loop exit
PB: predicated region body
PF: predicated region fallthrough
CT: control target
= control target key end

     0   :  { %s2506_s12 = smov 0   ;;  %s2508_s13 = smov 0   ;;  %s3332_s0 = inlined_call_operand.vmem [shape: bf16[2,2,10,18,8], index: 0, kind: input, shape index: {}]   ;;  %s3333_s1 = inlined_call_operand.vmem [shape: bf16[72,16], index: 1, kind: input, shape index: {}]   ;;  %s3334_s2 = inlined_call_operand.vmem [shape: f32[256,16], index: 2, kind: input, shape index: {}]   ;;  %s3335_s3 = inlined_call_operand.vmem [shape: f32[2,256,16], index: 3, kind: output, shape index: {}]  }
   0x1   :  { %s2510_s14 = smov 0   ;;  %s2512_s15 = smov 0  }
   0x2   :  { %s2514_s16 = smov 0  }
   0x3 LB: > { %s22_s17 = sadd.s32 1, %s2468_s14  ;;  %s25_s18 = sadd.s32 1, %s2472_s15  ;;  %s2476_s16 = sphi %s2514_s16, %s13_s16   ;;  %s2472_s15 = sphi %s2512_s15, %s3343_s15   ;;  %s2468_s14 = sphi %s2510_s14, %s3342_s14   ;;  %s2464_s13 = sphi %s2508_s13, %s3341_s13   ;;  %s2460_s12 = sphi %s2506_s12, %s3340_s12  }
   0x4   : > { %p23_p0 = scmp.ge.s32.totalorder %s22_s17, 2  ;;  %p2144_p1 = scmp.ge.s32.totalorder %s2476_s16, 1 }
   0x5   : > { %p168_p2 = scmp.lt.s32.totalorder %s2476_s16, 5 }
   0x6   : > { %s3345_s17 = smov (%p23_p0, %s22_s17), 0  ;;  %s3347_s18 = smov (!%p23_p0, %s25_s18), %s2472_s15 }
   0x7   : > { %p169_p3 = pnand %p2144_p1, %p168_p2  ;;  %p27_p4 = scmp.ge.s32.totalorder %s3347_s18, 2 }
   0x8   : > { %p205_p5 = scmp.lt.s32.totalorder (!%p169_p3), %s2464_s13, 1  ;;  %p207_p6 = scmp.lt.s32.totalorder (!%p169_p3), %s2460_s12, 1 }
   0x9   : > { %s3349_s18 = smov (%p27_p4, %s3347_s18), 0  ;;  %172 = sbr.rel (%p169_p3) target bundleno = 631 (0x277), region = 32 }
   0xa   : > { %s2478_s27 = smov (!%p169_p3), 8   ;;  %s2479_s28 = smov (!%p169_p3), 16  }
   0xb   : > { %s2480_s29 = smov (!%p169_p3), 24   ;;  %s2481_s30 = smov (!%p169_p3), 32  }
   0xc   : > { %s2482_s4 = smov (!%p169_p3), 40   ;;  %s2483_s5 = smov (!%p169_p3), 48  }
   0xd   : > { %s2484_s6 = smov (!%p169_p3), 56   ;;  %s2485_s7 = smov (!%p169_p3), 64  }
   0xe   : > { %s3351_s13 = smov (!%p205_p5, %s2464_s13), 1  ;;  %vm288_vm0 = vsmask.f32 3328  ;;  %vm289_vm1 = vsmask.f32 7440  ;;  %vm596_vm3 = vcmask 1042432  }
   0xf   : > { %s208_s19 = scalar_select %p207_p6, %s2460_s12, 1  ;;  %vm2557_vm2 = vmor %vm288_vm0, %vm289_vm1  ;;  %vm597_vm4 = vcmask 1046532   ;;  %vm247_vm6 = vcmask 60416   ;;  %vm531_vm7 = vcmask 126016   ;;  %vm703_vm8 = vcmask 191616  }
  0x10   : > { %s2389_s20 = smul.u32 60, %s3351_s13  ;;  %vm2625_vm5 = vmor %vm596_vm3, %vm597_vm4  ;;  %vm801_vm9 = vcmask 257216   ;;  %vm1082_vm10 = vcmask 322816   ;;  %vm1949_vm11 = vcmask 1043456   ;;  %vm1251_vm12 = vcmask 388416   ;;  %s2146_s25 = sshll.u32 %s2460_s12, 4 }
  0x11   : > { %s2388_s21 = smul.u32 30, %s208_s19  ;;  %vm1349_vm13 = vcmask 454016   ;;  %vm1630_vm14 = vcmask 519616   ;;  %vm1799_vm15 = vcmask 585216   ;;  %vm1924_vm0 = vcmask 588800   ;;  %p215_p7 = scmp.lt.s32.totalorder %s2146_s25, 31 }
  0x12   : > { %vm2018_vm1 = vcmask 130048  }
  0x13   : > { %s211_s22 = sadd.s32 %s2389_s20, %s2388_s21  ;;  %s3353_s25 = smov (!%p215_p7, %s2146_s25), 31 }
  0x14   : > { %s2145_s23 = sshll.u32 %s211_s22, 2 }
  0x15   : > { %s2546_s26 = scalar_lea.vmem %s3332_s0, %s2145_s23 }
  0x16   : > { %v267_v0 = vld [vmem:[%s2546_s26 + $0xc] sm:$0xf]  ;;  %v268_v1 = vld [vmem:[%s2546_s26 + $0x10] sm:$0xf]  ;;  %v264_v2 = vld [vmem:[%s2546_s26] sm:$0xf] }
  0x17   : > { %v316_v3 = vshrl.u32 %v267_v0, 16  ;;  %v319_v4 = vshll.u32 %v267_v0, 16  ;;  %v325_v5 = vshll.u32 %v268_v1, 16  ;;  %v329_v6 = vshrl.u32 %v268_v1, 16  ;;  %v265_v7 = vld [vmem:[%s2546_s26 + $0x4] sm:$0xf] }
  0x18   : > { %v292_v8 = vshrl.u32 %v264_v2, 16  ;;  %v295_v9 = vshll.u32 %v264_v2, 16  ;;  %v301_v10 = vshll.u32 %v265_v7, 16  ;;  %v305_v11 = vshrl.u32 %v265_v7, 16  ;;  %v269_v12 = vld [vmem:[%s2546_s26 + $0x14] sm:$0x1] }
  0x19   : > { %v318_v13 = vrot.slane %v316_v3, 4  ;;  %v321_v14 = vrot.slane %v319_v4, 5  ;;  %v327_v15 = vrot.slane %v325_v5, 5  ;;  %v331_v16 = vrot.slane %v329_v6, 4  ;;  %v266_v17 = vld [vmem:[%s2546_s26 + $0x8] sm:$0x1] }
  0x1a   : > { %v294_v18 = vrot.slane %v292_v8, 4  ;;  %v297_v19 = vrot.slane %v295_v9, 5  ;;  %v307_v20 = vrot.slane %v305_v11, 4  ;;  %v274_v21 = vld [vmem:[%s2546_s26 + $0x28] sm:$0xf]  ;;  %v303_v23 = vrot.slane %v301_v10, 5 }
  0x1b   : > { %v322_v22 = vor.u32 %v321_v14, %v318_v13  ;;  %v332_v24 = vor.u32 %v331_v16, %v327_v15  ;;  %v335_v27 = vshll.u32 %v269_v12, 16  ;;  %v373_v28 = vshll.u32 %v274_v21, 16  ;;  %v273_v30 = vld [vmem:[%s2546_s26 + $0x24] sm:$0xf]  ;;  %v270_v35 = vld [vmem:[%s2546_s26 + $0x18] sm:$0xf] }
  0x1c   : > { %v298_v26 = vor.u32 %v297_v19, %v294_v18  ;;  %v377_v29 = vshrl.u32 %v274_v21, 16  ;;  %v308_v32 = vor.u32 %v307_v20, %v303_v23  ;;  %v311_v33 = vshll.u32 %v266_v17, 16  ;;  %v271_v40 = vld [vmem:[%s2546_s26 + $0x1c] sm:$0xf]  ;;  %v275_v44 = vld [vmem:[%s2546_s26 + $0x2c] sm:$0x1] }
  0x1d   : > { %v323_v31 = vrot.slane %v322_v22, 4  ;;  %v2565_v37 = vrot.slane %v373_v28, 5  ;;  %v364_v39 = vshrl.u32 %v273_v30, 16  ;;  %v333_v42 = vrot.slane %v332_v24, 4  ;;  %v279_v50 = vld [vmem:[%s2546_s26 + $0x3c] sm:$0xf] }
  0x1e   : > { %v299_v34 = vrot.slane %v298_v26, 4  ;;  %v379_v38 = vrot.slane %v377_v29, 4  ;;  %v337_v43 = vrot.slane %v335_v27, 5  ;;  %v367_v45 = vshll.u32 %v273_v30, 16  ;;  %v277_v59 = vld [vmem:[%s2546_s26 + $0x34] sm:$0xf] }
  0x1f   : > { %v328_v36 = vsel %vm2557_vm2, %v323_v31, %v327_v15  ;;  %v309_v46 = vrot.slane %v308_v32, 4  ;;  %v313_v47 = vrot.slane %v311_v33, 5  ;;  %v340_v48 = vshrl.u32 %v270_v35, 16  ;;  %v272_v6 = vld [vmem:[%s2546_s26 + $0x20] sm:$0x1] }
  0x20   : > { %487 = vrot.lane.b32.xlu1 %v328_v36, %s2478_s27  ;;  %v304_v41 = vsel %vm2557_vm2, %v299_v34, %v303_v23  ;;  %v343_v49 = vshll.u32 %v270_v35, 16  ;;  %v366_v51 = vrot.slane %v364_v39, 4  ;;  %v369_v52 = vrot.slane %v367_v45, 5  ;;  %v280_v10 = vld [vmem:[%s2546_s26 + $0x40] sm:$0xf] }
  0x21   : > { %483 = vrot.lane.b32.xlu0 %v304_v41, %s2478_s27  ;;  %v349_v53 = vshll.u32 %v271_v40, 16  ;;  %v353_v54 = vshrl.u32 %v271_v40, 16  ;;  %v380_v55 = vor.u32 %v379_v38, %v2565_v37  ;;  %v383_v56 = vshll.u32 %v275_v44, 16  ;;  %v278_v15 = vld [vmem:[%s2546_s26 + $0x38] sm:$0x1] }
  0x22   : > { %v342_v57 = vrot.slane %v340_v48, 4  ;;  %v345_v58 = vrot.slane %v343_v49, 5  ;;  %v412_v61 = vshrl.u32 %v279_v50, 16  ;;  %v415_v62 = vshll.u32 %v279_v50, 16  ;;  %v283_v20 = vld [vmem:[%s2546_s26 + $0x4c] sm:$0xf] }
  0x23   : > { %v355_v60 = vrot.slane %v353_v54, 4  ;;  %v338_v63 = vsel %vm2557_vm2, %v333_v42, %v337_v43  ;;  %v351_v1 = vrot.slane %v349_v53, 5  ;;  %v314_v2 = vsel %vm2557_vm2, %v309_v46, %v313_v47  ;;  %v276_v21 = vld [vmem:[%s2546_s26 + $0x30] sm:$0xf]  ;;  %v282_v26 = vld [vmem:[%s2546_s26 + $0x48] sm:$0xf] }
  0x24   : > { %v346_v0 = vor.u32 %v345_v58, %v342_v57  ;;  %v370_v3 = vor.u32 %v369_v52, %v366_v51  ;;  %v397_v4 = vshll.u32 %v277_v59, 16  ;;  %v401_v5 = vshrl.u32 %v277_v59, 16  ;;  %v284_v48 = vld [vmem:[%s2546_s26 + $0x50] sm:$0x1]  ;;  %v286_v53 = vld [vmem:[%s2546_s26 + $0x58] sm:$0xf] }
  0x25   : > { %v381_v7 = vrot.slane %v380_v55, 4  ;;  %v385_v8 = vrot.slane %v383_v56, 5  ;;  %v414_v11 = vrot.slane %v412_v61, 4  ;;  %v417_v12 = vrot.slane %v415_v62, 5  ;;  %v281_v55 = vld [vmem:[%s2546_s26 + $0x44] sm:$0x1] }
  0x26   : > { %v347_v9 = vrot.slane %v346_v0, 4  ;;  %v356_v13 = vor.u32 %v355_v60, %v351_v1  ;;  %v399_v16 = vrot.slane %v397_v4, 5  ;;  %v403_v17 = vrot.slane %v401_v5, 4  ;;  %v285_v56 = vld [vmem:[%s2546_s26 + $0x54] sm:$0xf] }
  0x27   : > { %v359_v18 = vshll.u32 %v272_v6, 16  ;;  %v371_v19 = vrot.slane %v370_v3, 4  ;;  %v386_v22 = vsel %vm2557_vm2, %v381_v7, %v385_v8  ;;  %v418_v27 = vor.u32 %v417_v12, %v414_v11 }
  0x28   : > { %489 = vrot.lane.b32.xlu1 %v338_v63, %s2478_s27  ;;  %v352_v14 = vsel %vm2557_vm2, %v347_v9, %v351_v1  ;;  %v357_v23 = vrot.slane %v356_v13, 4  ;;  %v421_v28 = vshll.u32 %v280_v10, 16  ;;  %v425_v29 = vshrl.u32 %v280_v10, 16  ;;  %v287_v10 = vld [vmem:[%s2546_s26 + $0x5c] sm:$0x1] }
  0x29   : > { %485 = vrot.lane.b32.xlu0 %v314_v2, %s2478_s27  ;;  %491 = vrot.lane.b32.xlu2 %v352_v14, %s2478_s27  ;;  %v361_v24 = vrot.slane %v359_v18, 5  ;;  %v407_v30 = vshll.u32 %v278_v15, 16  ;;  %v404_v31 = vor.u32 %v403_v17, %v399_v16  ;;  %v445_v32 = vshll.u32 %v283_v20, 16  ;;  %v548_v17 = vld [vmem:[%s2546_s26] sm:$0xe] }
  0x2a   : > { %v449_v33 = vshrl.u32 %v283_v20, 16  ;;  %v388_v34 = vshrl.u32 %v276_v21, 16  ;;  %v376_v35 = vsel %vm2557_vm2, %v371_v19, %v2565_v37  ;;  %v436_v36 = vshrl.u32 %v282_v26, 16  ;;  %v549_v18 = vld [vmem:[%s2546_s26 + $0x4] sm:$0xf] }
  0x2b   : > { %v439_v38 = vshll.u32 %v282_v26, 16  ;;  %v391_v39 = vshll.u32 %v276_v21, 16  ;;  %v362_v40 = vsel %vm2557_vm2, %v357_v23, %v361_v24  ;;  %v419_v42 = vrot.slane %v418_v27, 4 }
  0x2c   : > { %v390_v41 = vrot.slane %v388_v34, 4  ;;  %v423_v43 = vrot.slane %v421_v28, 5  ;;  %v405_v45 = vrot.slane %v404_v31, 4  ;;  %v409_v37 = vrot.slane %v407_v30, 5  ;;  %v553_v34 = vld [vmem:[%s2546_s26 + $0x14] sm:$0x1] }
  0x2d   : > { %v393_v44 = vrot.slane %v391_v39, 5  ;;  %v447_v46 = vrot.slane %v445_v32, 5  ;;  %v451_v47 = vrot.slane %v449_v33, 4  ;;  %v438_v49 = vrot.slane %v436_v36, 4 }
  0x2e   : > { %v441_v50 = vrot.slane %v439_v38, 5  ;;  %v427_v52 = vrot.slane %v425_v29, 4  ;;  %v424_v57 = vsel %vm2557_vm2, %v419_v42, %v423_v43  ;;  %v410_v58 = vsel %vm2557_vm2, %v405_v45, %v409_v37  ;;  %v552_v29 = vld [vmem:[%s2546_s26 + $0x10] sm:$0xf]  ;;  %v550_v38 = vld [vmem:[%s2546_s26 + $0x8] sm:$0x1] }
  0x2f   : > { %v394_v51 = vor.u32 %v393_v44, %v390_v41  ;;  %v452_v59 = vor.u32 %v451_v47, %v447_v46  ;;  %v455_v60 = vshll.u32 %v284_v48, 16  ;;  %v469_v62 = vshll.u32 %v286_v53, 16  ;;  %v555_v42 = vld [vmem:[%s2546_s26 + $0x1c] sm:$0xf]  ;;  %v558_v47 = vld [vmem:[%s2546_s26 + $0x28] sm:$0xf] }
  0x30   : > { %497 = vrot.lane.b32.xlu1 %v386_v22, %s2478_s27  ;;  %v442_v61 = vor.u32 %v441_v50, %v438_v49  ;;  %v473_v63 = vshrl.u32 %v286_v53, 16  ;;  %v428_v0 = vor.u32 %v427_v52, %v423_v43  ;;  %v431_v2 = vshll.u32 %v281_v55, 16  ;;  %v556_v49 = vld [vmem:[%s2546_s26 + $0x20] sm:$0x1] }
  0x31   : > { %495 = vrot.lane.b32.xlu0 %v376_v35, %s2478_s27  ;;  %493 = vrot.lane.b32.xlu2 %v362_v40, %s2478_s27  ;;  %v395_v54 = vrot.slane %v394_v51, 4  ;;  %v460_v3 = vshrl.u32 %v285_v56, 16  ;;  %v463_v4 = vshll.u32 %v285_v56, 16  ;;  %v453_v5 = vrot.slane %v452_v59, 4  ;;  %v551_v35 = vld [vmem:[%s2546_s26 + $0xc] sm:$0xe] }
  0x32   : > { %v457_v6 = vrot.slane %v455_v60, 5  ;;  %v443_v7 = vrot.slane %v442_v61, 4  ;;  %v471_v8 = vrot.slane %v469_v62, 5  ;;  %v475_v9 = vrot.slane %v473_v63, 4  ;;  %v554_v51 = vld [vmem:[%s2546_s26 + $0x18] sm:$0xe] }
  0x33   : > { %v400_v1 = vsel %vm2557_vm2, %v395_v54, %v399_v16  ;;  %v429_v11 = vrot.slane %v428_v0, 4  ;;  %v433_v12 = vrot.slane %v431_v2, 5  ;;  %v462_v13 = vrot.slane %v460_v3, 4  ;;  %v561_v56 = vld [vmem:[%s2546_s26 + $0x34] sm:$0xf] }
  0x34   : > { %v465_v14 = vrot.slane %v463_v4, 5  ;;  %v458_v15 = vsel %vm2557_vm2, %v453_v5, %v457_v6  ;;  %v448_v16 = vsel %vm2557_vm2, %v443_v7, %v447_v46  ;;  %v476_v19 = vor.u32 %v475_v9, %v471_v8  ;;  %v557_v46 = vld [vmem:[%s2546_s26 + $0x24] sm:$0xe]  ;;  %v562_v61 = vld [vmem:[%s2546_s26 + $0x38] sm:$0x1] }
  0x35   : > { %v479_v20 = vshll.u32 %v287_v10, 16  ;;  %v434_v21 = vsel %vm2557_vm2, %v429_v11, %v433_v12  ;;  %v2151_v23 = vrot.slane %v548_v17, 9  ;;  %v601_v24 = vrot.slane %v549_v18, 5  ;;  %v560_v62 = vld [vmem:[%s2546_s26 + $0x30] sm:$0xe] }
  0x36   : > { %v466_v22 = vor.u32 %v465_v14, %v462_v13  ;;  %v477_v27 = vrot.slane %v476_v19, 4  ;;  %v608_v32 = vrot.slane %v552_v29, 5  ;;  %v611_v40 = vrot.slane %v553_v34, 5  ;;  %v559_v0 = vld [vmem:[%s2546_s26 + $0x2c] sm:$0x1] }
  0x37   : > { %v481_v28 = vrot.slane %v479_v20, 5  ;;  %v602_v31 = vsel %vm2625_vm5, %v2151_v23, %v601_v24  ;;  %v2152_v41 = vrot.slane %v551_v35, 9  ;;  %v603_v43 = vrot.slane %v601_v24, 4  ;;  %v564_v4 = vld [vmem:[%s2546_s26 + $0x40] sm:$0xf] }
  0x38   : > { %503 = vrot.lane.b32.xlu1 %v424_v57, %s2478_s27  ;;  %v467_v30 = vrot.slane %v466_v22, 4  ;;  %v610_v39 = vrot.slane %v608_v32, 4  ;;  %v604_v44 = vrot.slane %v550_v38, 5  ;;  %v615_v48 = vrot.slane %v555_v42, 5  ;;  %v566_v9 = vld [vmem:[%s2546_s26 + $0x48] sm:$0xe] }
  0x39   : > { %501 = vrot.lane.b32.xlu0 %v410_v58, %s2478_s27  ;;  %499 = vrot.lane.b32.xlu2 %v400_v1, %s2478_s27  ;;  %v482_v33 = vsel %vm2557_vm2, %v477_v27, %v481_v28  ;;  %v609_v37 = vsel %vm2625_vm5, %v2152_v41, %v608_v32  ;;  %v2154_v52 = vrot.slane %v557_v46, 9  ;;  %v622_v53 = vrot.slane %v558_v47, 5  ;;  %v567_v10 = vld [vmem:[%s2546_s26 + $0x4c] sm:$0xf]  ;;  %v565_v12 = vld [vmem:[%s2546_s26 + $0x44] sm:$0x1] }
  0x3a   : > { %v472_v36 = vsel %vm2557_vm2, %v467_v30, %v471_v8  ;;  %v612_v45 = vsel %vm2625_vm5, %v610_v39, %v611_v40  ;;  %v605_v50 = vsel %vm2625_vm5, %v603_v43, %v604_v44  ;;  %v617_v54 = vrot.slane %v615_v48, 4  ;;  %v563_v14 = vld [vmem:[%s2546_s26 + $0x3c] sm:$0xe]  ;;  %v570_v19 = vld [vmem:[%s2546_s26 + $0x58] sm:$0xf] }
  0x3b   : > { %v618_v55 = vrot.slane %v556_v49, 5  ;;  %v2153_v57 = vrot.slane %v554_v51, 9  ;;  %v623_v58 = vsel %vm2625_vm5, %v2154_v52, %v622_v53  ;;  %v629_v59 = vrot.slane %v561_v56, 5  ;;  %v571_v24 = vld [vmem:[%s2546_s26 + $0x5c] sm:$0x1] }
  0x3c   : > { %v632_v2 = vrot.slane %v562_v61, 5  ;;  %v2155_v3 = vrot.slane %v560_v62, 9  ;;  %v624_v5 = vrot.slane %v622_v53, 4  ;;  %v625_v6 = vrot.slane %v559_v0, 5  ;;  %v569_v27 = vld [vmem:[%s2546_s26 + $0x54] sm:$0xe] }
  0x3d   : > { %v619_v60 = vsel %vm2625_vm5, %v617_v54, %v618_v55  ;;  %v616_v63 = vsel %vm2625_vm5, %v2153_v57, %v615_v48  ;;  %v631_v1 = vrot.slane %v629_v59, 4  ;;  %v636_v11 = vrot.slane %v564_v4, 5  ;;  %v568_v29 = vld [vmem:[%s2546_s26 + $0x50] sm:$0x1]  ;;  %v235_v39 = vld [vmem:[%s2546_s26 + $0x18] sm:$0xf] }
  0x3e   : > { %v630_v8 = vsel %vm2625_vm5, %v2155_v3, %v629_v59  ;;  %v626_v13 = vsel %vm2625_vm5, %v624_v5, %v625_v6  ;;  %v639_v18 = vrot.slane %v565_v12, 5  ;;  %v2156_v20 = vrot.slane %v563_v14, 9  ;;  %252 = vst.msk [vmem:[#allocation2 + $0x10] sm:$0xf] %vm247_vm6, %v235_v39  ;;  %v233_v40 = vld [vmem:[%s2546_s26 + $0xc] sm:$0xf] }
  0x3f   : > { %v633_v7 = vsel %vm2625_vm5, %v631_v1, %v632_v2  ;;  %v638_v17 = vrot.slane %v636_v11, 4  ;;  %v650_v22 = vrot.slane %v570_v19, 5  ;;  %v2158_v32 = vrot.slane %v569_v27, 9  ;;  %v231_v41 = vld [vmem:[%s2546_s26] sm:$0xf] }
  0x40   : > { %509 = vrot.lane.b32.xlu1 %v458_v15, %s2478_s27  ;;  %v2157_v15 = vrot.slane %v566_v9, 9  ;;  %v637_v28 = vsel %vm2625_vm5, %v2156_v20, %v636_v11  ;;  %v646_v34 = vrot.slane %v568_v29, 5  ;;  %250 = vst.msk [vmem:[#allocation2 + $0x8] sm:$0xf] %vm247_vm6, %v233_v40  ;;  %v2161_v42 = vld [vmem:[%s2546_s26 + $0x18] sm:$0xf] }
  0x41   : > { %507 = vrot.lane.b32.xlu0 %v448_v16, %s2478_s27  ;;  %505 = vrot.lane.b32.xlu2 %v434_v21, %s2478_s27  ;;  %v643_v16 = vrot.slane %v567_v10, 5  ;;  %v640_v23 = vsel %vm2625_vm5, %v638_v17, %v639_v18  ;;  %v652_v30 = vrot.slane %v650_v22, 4  ;;  %248 = vst.msk [vmem:[#allocation2] sm:$0xf] %vm247_vm6, %v231_v41  ;;  %v2160_v43 = vld [vmem:[%s2546_s26 + $0x10] sm:$0xf] }
  0x42   : > { %v2159_v44 = vld [vmem:[%s2546_s26 + $0xc] sm:$0xf]  ;;  %v232_v46 = vld [vmem:[%s2546_s26 + $0x4] sm:$0xf]  ;;  %v2164_v47 = vld [vmem:[%s2546_s26 + $0x28] sm:$0xf] }
  0x43   : > { %v644_v21 = vsel %vm2625_vm5, %v2157_v15, %v643_v16  ;;  %249 = vst.msk [vmem:[#allocation2 + $0x4] sm:$0xf] %vm247_vm6, %v232_v46  ;;  %v2163_v48 = vld [vmem:[%s2546_s26 + $0x24] sm:$0xf]  ;;  %v2162_v49 = vld [vmem:[%s2546_s26 + $0x1c] sm:$0xf] }
  0x44   : > { %v238_v51 = vld [vmem:[%s2546_s26 + $0x28] sm:$0xf]  ;;  %v237_v52 = vld [vmem:[%s2546_s26 + $0x24] sm:$0xf]  ;;  %v2167_v54 = vld [vmem:[%s2546_s26 + $0x3c] sm:$0xf] }
  0x45   : > { %255 = vst.msk [vmem:[#allocation2 + $0x1c] sm:$0xf] %vm247_vm6, %v238_v51  ;;  %v2166_v55 = vld [vmem:[%s2546_s26 + $0x34] sm:$0xf]  ;;  %v2165_v56 = vld [vmem:[%s2546_s26 + $0x30] sm:$0xf] }
  0x46   : > { %254 = vst.msk [vmem:[#allocation2 + $0x18] sm:$0xf] %vm247_vm6, %v237_v52  ;;  %v2176_v57 = vld [vmem:[%s2546_s26 + $0x10] sm:$0xf]  ;;  %v242_v59 = vld [vmem:[%s2546_s26 + $0x40] sm:$0xf] }
  0x47   : > { %259 = vst.msk [vmem:[#allocation2 + $0x2c] sm:$0xf] %vm247_vm6, %v242_v59  ;;  %v240_v61 = vld [vmem:[%s2546_s26 + $0x34] sm:$0xf]  ;;  %v856_v0 = vshrl.u32 %v2176_v57, 16 }
  0x48   : > { %655 = vrot.lane.b32.xlu1 %v602_v31, %s2479_s28  ;;  %v653_v31 = vrot.slane %v571_v24, 5  ;;  %257 = vst.msk [vmem:[#allocation2 + $0x24] sm:$0xf] %vm247_vm6, %v240_v61  ;;  %v2170_v1 = vld [vmem:[%s2546_s26 + $0x4c] sm:$0xf] }
  0x49   : > { %513 = vrot.lane.b32.xlu0 %v482_v33, %s2478_s27  ;;  %511 = vrot.lane.b32.xlu2 %v472_v36, %s2478_s27  ;;  %v645_v33 = vrot.slane %v643_v16, 4  ;;  %v651_v36 = vsel %vm2625_vm5, %v2158_v32, %v650_v22  ;;  %v2169_v4 = vld [vmem:[%s2546_s26 + $0x48] sm:$0xf]  ;;  %v2168_v5 = vld [vmem:[%s2546_s26 + $0x40] sm:$0xf]  ;;  %s2149_s27 = sshll.u32 %s3351_s13, 5 }
  0x4a   : > { %v654_v35 = vsel %vm2625_vm5, %v652_v30, %v653_v31  ;;  %v2177_v6 = vld [vmem:[%s2546_s26 + $0x14] sm:$0x1]  ;;  %v2181_v11 = vld [vmem:[%s2546_s26 + $0x24] sm:$0xf]  ;;  %v2179_v15 = vld [vmem:[%s2546_s26 + $0x1c] sm:$0xf] }
  0x4b   : > { %v647_v38 = vsel %vm2625_vm5, %v645_v33, %v646_v34  ;;  %v245_v12 = vld [vmem:[%s2546_s26 + $0x54] sm:$0xf]  ;;  %v862_v14 = vshll.u32 %v2177_v6, 16  ;;  %v244_v17 = vld [vmem:[%s2546_s26 + $0x4c] sm:$0xf]  ;;  %v894_v22 = vshll.u32 %v2181_v11, 16 }
  0x4c   : > { %262 = vst.msk [vmem:[#allocation2 + $0x38] sm:$0xf] %vm247_vm6, %v245_v12  ;;  %v2178_v18 = vld [vmem:[%s2546_s26 + $0x18] sm:$0xf]  ;;  %v2173_v24 = vld [vmem:[%s2546_s26 + $0x60] sm:$0xf] }
  0x4d   : > { %v880_v29 = vshrl.u32 %v2179_v15, 16  ;;  %v2172_v30 = vld [vmem:[%s2546_s26 + $0x58] sm:$0xf]  ;;  %261 = vst.msk [vmem:[#allocation2 + $0x34] sm:$0xf] %vm247_vm6, %v244_v17  ;;  %v867_v31 = vshrl.u32 %v2178_v18, 16 }
  0x4e   : > { %v870_v32 = vshll.u32 %v2178_v18, 16  ;;  %v2171_v33 = vld [vmem:[%s2546_s26 + $0x54] sm:$0xf]  ;;  %v2182_v40 = vld [vmem:[%s2546_s26 + $0x28] sm:$0xf] }
  0x4f   : > { %v900_v52 = vshll.u32 %v2182_v40, 16  ;;  %v2183_v18 = vld [vmem:[%s2546_s26 + $0x2c] sm:$0x1] }
  0x50   : > { %661 = vrot.lane.b32.xlu1 %v612_v45, %s2479_s28  ;;  %v236_v45 = vld [vmem:[%s2546_s26 + $0x1c] sm:$0xf]  ;;  %v872_v46 = vrot.slane %v870_v32, 5 }
  0x51   : > { %659 = vrot.lane.b32.xlu0 %v609_v37, %s2479_s28  ;;  %657 = vrot.lane.b32.xlu2 %v605_v50, %s2479_s28  ;;  %253 = vst.msk [vmem:[#allocation2 + $0x14] sm:$0xf] %vm247_vm6, %v236_v45  ;;  %v234_v37 = vld [vmem:[%s2546_s26 + $0x10] sm:$0xf] }
  0x52   : > { %251 = vst.msk [vmem:[#allocation2 + $0xc] sm:$0xf] %vm247_vm6, %v234_v37  ;;  %v239_v50 = vld [vmem:[%s2546_s26 + $0x30] sm:$0xf]  ;;  %v869_v37 = vrot.slane %v867_v31, 4  ;;  %v910_v31 = vshll.u32 %v2183_v18, 16 }
  0x53   : > { %256 = vst.msk [vmem:[#allocation2 + $0x20] sm:$0xf] %vm247_vm6, %v239_v50  ;;  %v2184_v45 = vld [vmem:[%s2546_s26 + $0x30] sm:$0xf] }
  0x54   : > { %v873_v61 = vor.u32 %v872_v46, %v869_v37  ;;  %v912_v46 = vrot.slane %v910_v31, 5 }
  0x58   : > { %667 = vrot.lane.b32.xlu1 %v623_v58, %s2479_s28  ;;  %v2175_v58 = vld [vmem:[%s2546_s26 + $0xc] sm:$0xf] }
  0x59   : > { %665 = vrot.lane.b32.xlu0 %v619_v60, %s2479_s28  ;;  %663 = vrot.lane.b32.xlu2 %v616_v63, %s2479_s28  ;;  %v241_v60 = vld [vmem:[%s2546_s26 + $0x3c] sm:$0xf]  ;;  %v852_v63 = vshll.u32 %v2176_v57, 16  ;;  %v843_v2 = vshrl.u32 %v2175_v58, 16  ;;  %v846_v3 = vshll.u32 %v2175_v58, 16  ;;  %v918_v57 = vshll.u32 %v2184_v45, 16 }
  0x5a   : > { %258 = vst.msk [vmem:[#allocation2 + $0x28] sm:$0xf] %vm247_vm6, %v241_v60 }
  0x5b   : > { %v845_v9 = vrot.slane %v843_v2, 4  ;;  %v848_v10 = vrot.slane %v846_v3, 5  ;;  %v2186_v2 = vld [vmem:[%s2546_s26 + $0x38] sm:$0x1]  ;;  %v920_v6 = vrot.slane %v918_v57, 5 }
  0x5d   : > { %v849_v27 = vor.u32 %v848_v10, %v845_v9  ;;  %v874_v10 = vrot.slane %v873_v61, 4 }
  0x5f   : > { %v850_v39 = vrot.slane %v849_v27, 4 }
  0x60   : > { %673 = vrot.lane.b32.xlu1 %v633_v7, %s2479_s28  ;;  %v2757_v7 = vrot.slane %v852_v63, 5  ;;  %v2174_v63 = vld [vmem:[%s2546_s26 + $0x64] sm:$0xf] }
  0x61   : > { %671 = vrot.lane.b32.xlu0 %v630_v8, %s2479_s28  ;;  %669 = vrot.lane.b32.xlu2 %v626_v13, %s2479_s28  ;;  %v858_v8 = vrot.slane %v856_v0, 4 }
  0x62   : > { %v855_v58 = vsel %vm2557_vm2, %v850_v39, %v2757_v7 }
  0x63   : > { %v859_v19 = vor.u32 %v858_v8, %v2757_v7 }
  0x65   : > { %v860_v34 = vrot.slane %v859_v19, 4  ;;  %v2187_v19 = vld [vmem:[%s2546_s26 + $0x3c] sm:$0xf] }
  0x66   : > { %v939_v32 = vshrl.u32 %v2187_v19, 16 }
  0x68   : > { %679 = vrot.lane.b32.xlu1 %v644_v21, %s2479_s28  ;;  %v891_v21 = vshrl.u32 %v2181_v11, 16  ;;  %v2193_v11 = vld [vmem:[%s2546_s26 + $0x54] sm:$0xf] }
  0x69   : > { %677 = vrot.lane.b32.xlu0 %v640_v23, %s2479_s28  ;;  %675 = vrot.lane.b32.xlu2 %v637_v28, %s2479_s28  ;;  %v243_v23 = vld [vmem:[%s2546_s26 + $0x48] sm:$0xf]  ;;  %v876_v28 = vshll.u32 %v2179_v15, 16 }
  0x6a   : > { %260 = vst.msk [vmem:[#allocation2 + $0x30] sm:$0xf] %vm247_vm6, %v243_v23  ;;  %v990_v23 = vshll.u32 %v2193_v11, 16 }
  0x6b   : > { %v2780_v41 = vrot.slane %v876_v28, 5 }
  0x6c   : > { %v992_v39 = vrot.slane %v990_v23, 5 }
  0x6d   : > { %v879_v27 = vsel %vm2557_vm2, %v874_v10, %v2780_v41  ;;  %v2211_v10 = vld [vmem:[%s2546_s26 + $0x3c] sm:$0xe] }
  0x70   : > { %685 = vrot.lane.b32.xlu1 %v654_v35, %s2479_s28  ;;  %v864_v35 = vrot.slane %v862_v14, 5  ;;  %v2188_v14 = vld [vmem:[%s2546_s26 + $0x40] sm:$0xf] }
  0x71   : > { %683 = vrot.lane.b32.xlu0 %v651_v36, %s2479_s28  ;;  %681 = vrot.lane.b32.xlu2 %v647_v38, %s2479_s28  ;;  %v893_v36 = vrot.slane %v891_v21, 4  ;;  %v896_v38 = vrot.slane %v894_v22, 5  ;;  %v987_v22 = vshrl.u32 %v2193_v11, 16  ;;  %v948_v28 = vshll.u32 %v2188_v14, 16 }
  0x72   : > { %v865_v50 = vsel %vm2557_vm2, %v860_v34, %v864_v35 }
  0x73   : > { %v897_v51 = vor.u32 %v896_v38, %v893_v36  ;;  %v989_v38 = vrot.slane %v987_v22, 4 }
  0x75   : > { %v898_v0 = vrot.slane %v897_v51, 4  ;;  %v993_v51 = vor.u32 %v992_v39, %v989_v38  ;;  %v2260_v38 = vld [vmem:[%s2546_s26 + $0x4c] sm:$0xf] }
  0x78   : > { %757 = vrot.lane.b32.xlu1 %v2161_v42, %s2480_s29  ;;  %v882_v42 = vrot.slane %v880_v29, 4  ;;  %v952_v29 = vshrl.u32 %v2188_v14, 16 }
  0x79   : > { %755 = vrot.lane.b32.xlu0 %v2160_v43, %s2480_s29  ;;  %753 = vrot.lane.b32.xlu2 %v2159_v44, %s2480_s29  ;;  %v2185_v44 = vld [vmem:[%s2546_s26 + $0x34] sm:$0xf] }
  0x7a   : > { %v883_v59 = vor.u32 %v882_v42, %v2780_v41  ;;  %v2194_v41 = vld [vmem:[%s2546_s26 + $0x58] sm:$0xf]  ;;  %v2189_v42 = vld [vmem:[%s2546_s26 + $0x44] sm:$0x1] }
  0x7c   : > { %v884_v8 = vrot.slane %v883_v59, 4  ;;  %v994_v59 = vrot.slane %v993_v51, 4 }
  0x80   : > { %763 = vrot.lane.b32.xlu1 %v2164_v47, %s2480_s29 }
  0x81   : > { %761 = vrot.lane.b32.xlu0 %v2163_v48, %s2480_s29  ;;  %759 = vrot.lane.b32.xlu2 %v2162_v49, %s2480_s29  ;;  %v2180_v48 = vld [vmem:[%s2546_s26 + $0x20] sm:$0x1]  ;;  %v246_v49 = vld [vmem:[%s2546_s26 + $0x58] sm:$0xf] }
  0x82   : > { %v886_v60 = vshll.u32 %v2180_v48, 16  ;;  %263 = vst.msk [vmem:[#allocation2 + $0x3c] sm:$0xf] %vm247_vm6, %v246_v49 }
  0x83   : > { %v492_v53 = vpop.permute.xlu2 %491 }
  0x84   : > { %536 = vst.msk [vmem:[#allocation2 + $0x10] sm:$0xf] %vm531_vm7, %v492_v53  ;;  %v888_v9 = vrot.slane %v886_v60, 5 }
  0x88   : > { %769 = vrot.lane.b32.xlu1 %v2167_v54, %s2480_s29  ;;  %v924_v54 = vshll.u32 %v2185_v44, 16 }
  0x89   : > { %767 = vrot.lane.b32.xlu0 %v2166_v55, %s2480_s29  ;;  %765 = vrot.lane.b32.xlu2 %v2165_v56, %s2480_s29  ;;  %v928_v55 = vshrl.u32 %v2185_v44, 16  ;;  %v915_v56 = vshrl.u32 %v2184_v45, 16  ;;  %v954_v44 = vrot.slane %v952_v29, 4 }
  0x8a   : > { %v2801_v3 = vrot.slane %v924_v54, 5 }
  0x8b   : > { %v494_v62 = vpop.permute.xlu2 %493 }
  0x8c   : > { %537 = vst.msk [vmem:[#allocation2 + $0x14] sm:$0xf] %vm531_vm7, %v494_v62  ;;  %v904_v62 = vshrl.u32 %v2182_v40, 16 }
  0x8e   : > { %v906_v15 = vrot.slane %v904_v62, 4 }
  0x90   : > { %775 = vrot.lane.b32.xlu1 %v2170_v1, %s2480_s29  ;;  %v902_v1 = vrot.slane %v900_v52, 5  ;;  %v996_v52 = vshll.u32 %v2194_v41, 16 }
  0x91   : > { %773 = vrot.lane.b32.xlu0 %v2169_v4, %s2480_s29  ;;  %771 = vrot.lane.b32.xlu2 %v2168_v5, %s2480_s29  ;;  %v930_v4 = vrot.slane %v928_v55, 4  ;;  %v917_v5 = vrot.slane %v915_v56, 4  ;;  %v958_v55 = vshll.u32 %v2189_v42, 16  ;;  %v1000_v56 = vshrl.u32 %v2194_v41, 16  ;;  %v2239_v41 = vld [vmem:[%s2546_s26 + $0x48] sm:$0xf] }
  0x92   : > { %v488_v13 = vpop.permute.xlu1 %487  ;;  %v998_v60 = vrot.slane %v996_v52, 5  ;;  %v2266_v52 = vld [vmem:[%s2546_s26 + $0x64] sm:$0xf] }
  0x93   : > { %534 = vst.msk [vmem:[#allocation2 + $0x8] sm:$0xf] %vm531_vm7, %v488_v13  ;;  %v484_v16 = vpop.permute.xlu0 %483  ;;  %v500_v20 = vpop.permute.xlu2 %499  ;;  %v934_v13 = vshll.u32 %v2186_v2, 16  ;;  %v921_v21 = vor.u32 %v920_v6, %v917_v5  ;;  %v2195_v5 = vld [vmem:[%s2546_s26 + $0x5c] sm:$0x1] }
  0x94   : > { %532 = vst.msk [vmem:[#allocation2] sm:$0xf] %vm531_vm7, %v484_v16  ;;  %v903_v16 = vsel %vm2557_vm2, %v898_v0, %v902_v1  ;;  %v2212_v0 = vld [vmem:[%s2546_s26 + $0x40] sm:$0xf]  ;;  %v999_v6 = vsel %vm2557_vm2, %v994_v59, %v998_v60 }
  0x95   : > { %540 = vst.msk [vmem:[#allocation2 + $0x20] sm:$0xf] %vm531_vm7, %v500_v20  ;;  %v931_v20 = vor.u32 %v930_v4, %v2801_v3  ;;  %v936_v34 = vrot.slane %v934_v13, 5  ;;  %v922_v36 = vrot.slane %v921_v21, 4  ;;  %v1006_v13 = vshll.u32 %v2195_v5, 16 }
  0x97   : > { %v932_v35 = vrot.slane %v931_v20, 4  ;;  %v1008_v21 = vrot.slane %v1006_v13, 5 }
  0x98   : > { %781 = vrot.lane.b32.xlu1 %v2173_v24, %s2480_s29  ;;  %v889_v24 = vsel %vm2557_vm2, %v884_v8, %v888_v9  ;;  %v2213_v9 = vld [vmem:[%s2546_s26 + $0x44] sm:$0x1] }
  0x99   : > { %779 = vrot.lane.b32.xlu0 %v2172_v30, %s2480_s29  ;;  %777 = vrot.lane.b32.xlu2 %v2171_v33, %s2480_s29  ;;  %v907_v30 = vor.u32 %v906_v15, %v902_v1  ;;  %v942_v33 = vshll.u32 %v2187_v19, 16  ;;  %v1180_v15 = vrot.slane %v2213_v9, 5  ;;  %v2218_v19 = vld [vmem:[%s2546_s26 + $0x58] sm:$0xf] }
  0x9a   : > { %v490_v43 = vpop.permute.xlu1 %489 }
  0x9b   : > { %535 = vst.msk [vmem:[#allocation2 + $0xc] sm:$0xf] %vm531_vm7, %v490_v43  ;;  %v486_v47 = vpop.permute.xlu0 %485  ;;  %v506_v53 = vpop.permute.xlu2 %505  ;;  %v950_v43 = vrot.slane %v948_v28, 5  ;;  %v908_v37 = vrot.slane %v907_v30, 4  ;;  %v944_v48 = vrot.slane %v942_v33, 5 }
  0x9c   : > { %533 = vst.msk [vmem:[#allocation2 + $0x4] sm:$0xf] %vm531_vm7, %v486_v47  ;;  %v941_v47 = vrot.slane %v939_v32, 4  ;;  %v2219_v28 = vld [vmem:[%s2546_s26 + $0x5c] sm:$0x1] }
  0x9d   : > { %543 = vst.msk [vmem:[#allocation2 + $0x2c] sm:$0xf] %vm531_vm7, %v506_v53  ;;  %v927_v53 = vsel %vm2557_vm2, %v922_v36, %v2801_v3  ;;  %v955_v54 = vor.u32 %v954_v44, %v950_v43  ;;  %v913_v57 = vsel %vm2557_vm2, %v908_v37, %v912_v46  ;;  %v1002_v3 = vrot.slane %v1000_v56, 4  ;;  %v2217_v30 = vld [vmem:[%s2546_s26 + $0x54] sm:$0xe] }
  0x9e   : > { %v1194_v33 = vrot.slane %v2219_v28, 5  ;;  %v2229_v36 = vrot.slane %v2217_v30, 9  ;;  %v1500_v37 = vshrl.u32 %v2260_v38, 16  ;;  %v2261_v56 = vld [vmem:[%s2546_s26 + $0x50] sm:$0x1] }
  0x9f   : > { %v956_v62 = vrot.slane %v955_v54, 4 }
  0xa0   : > { %1036 = vrot.lane.b32.xlu1 %v865_v50, %s2481_s30  ;;  %v937_v50 = vsel %vm2557_vm2, %v932_v35, %v936_v34  ;;  %v2265_v34 = vld [vmem:[%s2546_s26 + $0x60] sm:$0xf]  ;;  %v1502_v54 = vrot.slane %v1500_v37, 4 }
  0xa1   : > { %1034 = vrot.lane.b32.xlu0 %v855_v58, %s2481_s30  ;;  %783 = vrot.lane.b32.xlu2 %v2174_v63, %s2480_s29  ;;  %v945_v58 = vor.u32 %v944_v48, %v941_v47  ;;  %v960_v63 = vrot.slane %v958_v55, 5  ;;  %v1535_v42 = vshrl.u32 %v2265_v34, 16 }
  0xa2   : > { %v498_v7 = vpop.permute.xlu1 %497 }
  0xa3   : > { %539 = vst.msk [vmem:[#allocation2 + $0x1c] sm:$0xf] %vm531_vm7, %v498_v7  ;;  %v496_v12 = vpop.permute.xlu0 %495  ;;  %v512_v17 = vpop.permute.xlu2 %511  ;;  %v946_v2 = vrot.slane %v945_v58, 4  ;;  %v1177_v7 = vrot.slane %v2212_v0, 5  ;;  %v961_v8 = vsel %vm2557_vm2, %v956_v62, %v960_v63  ;;  %v1544_v62 = vshll.u32 %v2266_v52, 16 }
  0xa4   : > { %538 = vst.msk [vmem:[#allocation2 + $0x18] sm:$0xf] %vm531_vm7, %v496_v12  ;;  %v1003_v12 = vor.u32 %v1002_v3, %v998_v60  ;;  %v2244_v60 = vld [vmem:[%s2546_s26 + $0x64] sm:$0xf]  ;;  %v2243_v63 = vld [vmem:[%s2546_s26 + $0x60] sm:$0xf] }
  0xa5   : > { %546 = vst.msk [vmem:[#allocation2 + $0x38] sm:$0xf] %vm531_vm7, %v512_v17  ;;  %v951_v11 = vsel %vm2557_vm2, %v946_v2, %v950_v43  ;;  %v1179_v14 = vrot.slane %v1177_v7, 4  ;;  %v2227_v17 = vrot.slane %v2211_v10, 9  ;;  %v1538_v43 = vshll.u32 %v2265_v34, 16 }
  0xa6   : > { %v1004_v20 = vrot.slane %v1003_v12, 4  ;;  %v1548_v2 = vshrl.u32 %v2266_v52, 16  ;;  %v2240_v3 = vld [vmem:[%s2546_s26 + $0x4c] sm:$0xf] }
  0xa7   : > { %v1181_v23 = vsel %vm2625_vm5, %v1179_v14, %v1180_v15  ;;  %v2284_v10 = vld [vmem:[%s2546_s26 + $0x4c] sm:$0xf]  ;;  %v2267_v15 = vld [vmem:[%s2546_s26 + $0x68] sm:$0x1] }
  0xa8   : > { %1042 = vrot.lane.b32.xlu1 %v903_v16, %s2481_s30  ;;  %v1009_v29 = vsel %vm2557_vm2, %v1004_v20, %v1008_v21  ;;  %v1550_v13 = vrot.slane %v1548_v2, 4  ;;  %v2283_v20 = vld [vmem:[%s2546_s26 + $0x48] sm:$0xe] }
  0xa9   : > { %1040 = vrot.lane.b32.xlu0 %v889_v24, %s2481_s30  ;;  %1038 = vrot.lane.b32.xlu2 %v879_v27, %s2481_s30  ;;  %v1178_v24 = vsel %vm2625_vm5, %v2227_v17, %v1177_v7  ;;  %v1191_v27 = vrot.slane %v2218_v19, 5  ;;  %v1725_v17 = vrot.slane %v2284_v10, 5  ;;  %v2285_v19 = vld [vmem:[%s2546_s26 + $0x50] sm:$0x1] }
  0xaa   : > { %v504_v40 = vpop.permute.xlu1 %503 }
  0xab   : > { %542 = vst.msk [vmem:[#allocation2 + $0x28] sm:$0xf] %vm531_vm7, %v504_v40  ;;  %v502_v45 = vpop.permute.xlu0 %501  ;;  %v658_v49 = vpop.permute.xlu2 %657  ;;  %v1193_v32 = vrot.slane %v1191_v27, 4  ;;  %v2259_v40 = vld [vmem:[%s2546_s26 + $0x48] sm:$0xf]  ;;  %v1192_v46 = vsel %vm2625_vm5, %v2229_v36, %v1191_v27  ;;  %v1728_v27 = vrot.slane %v2285_v19, 5 }
  0xac   : > { %541 = vst.msk [vmem:[#allocation2 + $0x24] sm:$0xf] %vm531_vm7, %v502_v45  ;;  %v1496_v45 = vshll.u32 %v2260_v38, 16  ;;  %v1487_v47 = vshrl.u32 %v2259_v40, 16  ;;  %v1490_v48 = vshll.u32 %v2259_v40, 16 }
  0xad   : > { %705 = vst.msk [vmem:[#allocation2 + $0x4] sm:$0xf] %vm703_vm8, %v658_v49  ;;  %v1195_v44 = vsel %vm2625_vm5, %v1193_v32, %v1194_v33  ;;  %v1537_v49 = vrot.slane %v1535_v42, 4  ;;  %v2199_v38 = vld [vmem:[%s2546_s26 + $0xc] sm:$0xe] }
  0xae   : > { %v1492_v58 = vrot.slane %v1490_v48, 5  ;;  %v2206_v48 = vld [vmem:[%s2546_s26 + $0x28] sm:$0xf]  ;;  %v2254_v19 = vld [vmem:[%s2546_s26 + $0x34] sm:$0xf] }
  0xb0   : > { %1048 = vrot.lane.b32.xlu1 %v937_v50, %s2481_s30  ;;  %v1540_v50 = vrot.slane %v1538_v43, 5  ;;  %v2289_v43 = vld [vmem:[%s2546_s26 + $0x60] sm:$0xe] }
  0xb1   : > { %1046 = vrot.lane.b32.xlu0 %v927_v53, %s2481_s30  ;;  %1044 = vrot.lane.b32.xlu2 %v913_v57, %s2481_s30  ;;  %v1498_v53 = vrot.slane %v1496_v45, 5  ;;  %v1489_v57 = vrot.slane %v1487_v47, 4 }
  0xb2   : > { %v510_v61 = vpop.permute.xlu1 %509 }
  0xb3   : > { %545 = vst.msk [vmem:[#allocation2 + $0x34] sm:$0xf] %vm531_vm7, %v510_v61  ;;  %v508_v1 = vpop.permute.xlu0 %507  ;;  %v664_v4 = vpop.permute.xlu2 %663  ;;  %v1541_v61 = vor.u32 %v1540_v50, %v1537_v49  ;;  %v1503_v0 = vor.u32 %v1502_v54, %v1498_v53  ;;  %v2301_v50 = vrot.slane %v2289_v43, 9 }
  0xb4   : > { %544 = vst.msk [vmem:[#allocation2 + $0x30] sm:$0xf] %vm531_vm7, %v508_v1  ;;  %v1506_v1 = vshll.u32 %v2261_v56, 16  ;;  %v2205_v56 = vld [vmem:[%s2546_s26 + $0x24] sm:$0xe] }
  0xb5   : > { %708 = vst.msk [vmem:[#allocation2 + $0x10] sm:$0xf] %vm703_vm8, %v664_v4  ;;  %v1493_v4 = vor.u32 %v1492_v58, %v1489_v57  ;;  %v1542_v5 = vrot.slane %v1541_v61, 4  ;;  %v2201_v58 = vld [vmem:[%s2546_s26 + $0x14] sm:$0x1] }
  0xb6   : > { %v1508_v9 = vrot.slane %v1506_v1, 5  ;;  %v1152_v2 = vrot.slane %v2201_v58, 5  ;;  %v2278_v58 = vld [vmem:[%s2546_s26 + $0x34] sm:$0xf] }
  0xb7   : > { %v1494_v12 = vrot.slane %v1493_v4, 4 }
  0xb8   : > { %1058 = vrot.lane.b32.xlu1 %v999_v6, %s2481_s30  ;;  %v1546_v6 = vrot.slane %v1544_v62, 5  ;;  %v2225_v62 = vrot.slane %v2205_v56, 9 }
  0xb9   : > { %1052 = vrot.lane.b32.xlu0 %v961_v8, %s2481_s30  ;;  %1050 = vrot.lane.b32.xlu2 %v951_v11, %s2481_s30  ;;  %v1504_v8 = vrot.slane %v1503_v0, 4  ;;  %v1499_v21 = vsel %vm2557_vm2, %v1494_v12, %v1498_v53  ;;  %v1163_v53 = vrot.slane %v2206_v48, 5  ;;  %v2272_v48 = vld [vmem:[%s2546_s26 + $0x1c] sm:$0xf] }
  0xba   : > { %v656_v16 = vpop.permute.xlu1 %655 }
  0xbb   : > { %704 = vst.msk [vmem:[#allocation2] sm:$0xf] %vm703_vm8, %v656_v16  ;;  %v514_v18 = vpop.permute.xlu0 %513  ;;  %v670_v22 = vpop.permute.xlu2 %669  ;;  %v1547_v16 = vsel %vm2557_vm2, %v1542_v5, %v1546_v6 }
  0xbc   : > { %547 = vst.msk [vmem:[#allocation2 + $0x3c] sm:$0xf] %vm531_vm7, %v514_v18  ;;  %v1509_v18 = vsel %vm2557_vm2, %v1504_v8, %v1508_v9  ;;  %v1164_v8 = vsel %vm2625_vm5, %v2225_v62, %v1163_v53 }
  0xbd   : > { %711 = vst.msk [vmem:[#allocation2 + $0x1c] sm:$0xf] %vm703_vm8, %v670_v22  ;;  %v1551_v22 = vor.u32 %v1550_v13, %v1546_v6 }
  0xbf   : > { %v1552_v32 = vrot.slane %v1551_v22, 4  ;;  %v2235_v22 = vld [vmem:[%s2546_s26 + $0x30] sm:$0xf] }
  0xc0   : > { %1221 = vrot.lane.b32.xlu1 %v1181_v23, %s2482_s4  ;;  %v1554_v23 = vshll.u32 %v2267_v15, 16  ;;  %v2249_v15 = vld [vmem:[%s2546_s26 + $0x20] sm:$0x1] }
  0xc1   : > { %1219 = vrot.lane.b32.xlu0 %v1178_v24, %s2482_s4  ;;  %1060 = vrot.lane.b32.xlu2 %v1009_v29, %s2481_s30  ;;  %v1727_v24 = vrot.slane %v1725_v17, 4  ;;  %v2299_v29 = vrot.slane %v2283_v20, 9 }
  0xc2   : > { %v662_v31 = vpop.permute.xlu1 %661  ;;  %v1556_v33 = vrot.slane %v1554_v23, 5 }
  0xc3   : > { %707 = vst.msk [vmem:[#allocation2 + $0xc] sm:$0xf] %vm703_vm8, %v662_v31  ;;  %v660_v35 = vpop.permute.xlu0 %659  ;;  %v676_v39 = vpop.permute.xlu2 %675  ;;  %v2290_v31 = vld [vmem:[%s2546_s26 + $0x64] sm:$0xf]  ;;  %v1726_v36 = vsel %vm2625_vm5, %v2299_v29, %v1725_v17  ;;  %v1448_v29 = vshll.u32 %v2254_v19, 16 }
  0xc4   : > { %706 = vst.msk [vmem:[#allocation2 + $0x8] sm:$0xf] %vm703_vm8, %v660_v35  ;;  %v1729_v35 = vsel %vm2625_vm5, %v1727_v24, %v1728_v27  ;;  %v1739_v40 = vrot.slane %v2290_v31, 5  ;;  %v1557_v42 = vsel %vm2557_vm2, %v1552_v32, %v1556_v33  ;;  %v1410_v24 = vshll.u32 %v2249_v15, 16  ;;  %v2232_v27 = vld [vmem:[%s2546_s26 + $0x1c] sm:$0xf] }
  0xc5   : > { %714 = vst.msk [vmem:[#allocation2 + $0x28] sm:$0xf] %vm703_vm8, %v676_v39  ;;  %v2200_v39 = vld [vmem:[%s2546_s26 + $0x10] sm:$0xf]  ;;  %v2231_v31 = vld [vmem:[%s2546_s26 + $0x18] sm:$0xf] }
  0xc6   : > { %v1149_v45 = vrot.slane %v2200_v39, 5  ;;  %v1740_v57 = vsel %vm2625_vm5, %v2301_v50, %v1739_v40  ;;  %v1450_v39 = vrot.slane %v1448_v29, 5 }
  0xc8   : > { %1317 = vrot.lane.b32.xlu1 %v2239_v41, %s2483_s5  ;;  %v2291_v41 = vld [vmem:[%s2546_s26 + $0x68] sm:$0x1]  ;;  %v1151_v1 = vrot.slane %v1149_v45, 4 }
  0xc9   : > { %1229 = vrot.lane.b32.xlu0 %v1195_v44, %s2482_s4  ;;  %1227 = vrot.lane.b32.xlu2 %v1192_v46, %s2482_s4  ;;  %v2223_v44 = vrot.slane %v2199_v38, 9  ;;  %v1741_v46 = vrot.slane %v1739_v40, 4  ;;  %v1742_v47 = vrot.slane %v2291_v41, 5 }
  0xca   : > { %v668_v51 = vpop.permute.xlu1 %667 }
  0xcb   : > { %710 = vst.msk [vmem:[#allocation2 + $0x18] sm:$0xf] %vm703_vm8, %v668_v51  ;;  %v666_v55 = vpop.permute.xlu0 %665  ;;  %v682_v59 = vpop.permute.xlu2 %681  ;;  %v1150_v52 = vsel %vm2625_vm5, %v2223_v44, %v1149_v45  ;;  %v1743_v54 = vsel %vm2625_vm5, %v1741_v46, %v1742_v47  ;;  %v2271_v47 = vld [vmem:[%s2546_s26 + $0x18] sm:$0xe] }
  0xcc   : > { %709 = vst.msk [vmem:[#allocation2 + $0x14] sm:$0xf] %vm703_vm8, %v666_v55  ;;  %v2207_v55 = vld [vmem:[%s2546_s26 + $0x2c] sm:$0x1] }
  0xcd   : > { %717 = vst.msk [vmem:[#allocation2 + $0x34] sm:$0xf] %vm703_vm8, %v682_v59  ;;  %v1165_v59 = vrot.slane %v1163_v53, 4  ;;  %v2295_v53 = vrot.slane %v2271_v47, 9 }
  0xd0   : > { %1327 = vrot.lane.b32.xlu1 %v2244_v60, %s2483_s5  ;;  %v1166_v60 = vrot.slane %v2207_v55, 5 }
  0xd1   : > { %1325 = vrot.lane.b32.xlu0 %v2243_v63, %s2483_s5  ;;  %1319 = vrot.lane.b32.xlu2 %v2240_v3, %s2483_s5  ;;  %v2248_v63 = vld [vmem:[%s2546_s26 + $0x1c] sm:$0xf]  ;;  %v2247_v3 = vld [vmem:[%s2546_s26 + $0x18] sm:$0xf] }
  0xd2   : > { %v674_v7 = vpop.permute.xlu1 %673  ;;  %v1167_v5 = vsel %vm2625_vm5, %v1165_v59, %v1166_v60  ;;  %v1400_v6 = vshll.u32 %v2248_v63, 16  ;;  %v1391_v9 = vshrl.u32 %v2247_v3, 16  ;;  %v1394_v10 = vshll.u32 %v2247_v3, 16  ;;  %v2196_v59 = vld [vmem:[%s2546_s26 + $0x60] sm:$0xf] }
  0xd3   : > { %713 = vst.msk [vmem:[#allocation2 + $0x24] sm:$0xf] %vm703_vm8, %v674_v7  ;;  %v672_v11 = vpop.permute.xlu0 %671  ;;  %v754_v14 = vpop.permute.xlu2 %753  ;;  %v1404_v7 = vshrl.u32 %v2248_v63, 16  ;;  %v2191_v63 = vld [vmem:[%s2546_s26 + $0x4c] sm:$0xf]  ;;  %v1711_v3 = vrot.slane %v2278_v58, 5 }
  0xd4   : > { %712 = vst.msk [vmem:[#allocation2 + $0x20] sm:$0xf] %vm703_vm8, %v672_v11  ;;  %v1153_v11 = vsel %vm2625_vm5, %v1151_v1, %v1152_v2  ;;  %v1402_v12 = vrot.slane %v1400_v6, 5  ;;  %v1396_v17 = vrot.slane %v1394_v10, 5  ;;  %v2190_v1 = vld [vmem:[%s2546_s26 + $0x48] sm:$0xf] }
  0xd5   : > { %802 = vst.msk [vmem:[#allocation2] sm:$0xf] %vm801_vm9, %v754_v14  ;;  %v1406_v13 = vrot.slane %v1404_v7, 4  ;;  %v2277_v7 = vld [vmem:[%s2546_s26 + $0x30] sm:$0xe]  ;;  %v1713_v15 = vrot.slane %v1711_v3, 4 }
  0xd7   : > { %v1407_v23 = vor.u32 %v1406_v13, %v1402_v12 }
  0xd8   : > { %1606 = vrot.lane.b32.xlu1 %v1547_v16, %s2484_s6  ;;  %v1393_v16 = vrot.slane %v1391_v9, 4  ;;  %v976_v9 = vshrl.u32 %v2191_v63, 16 }
  0xd9   : > { %1600 = vrot.lane.b32.xlu0 %v1509_v18, %s2484_s6  ;;  %1598 = vrot.lane.b32.xlu2 %v1499_v21, %s2484_s6  ;;  %v2253_v21 = vld [vmem:[%s2546_s26 + $0x30] sm:$0xf] }
  0xda   : > { %v680_v28 = vpop.permute.xlu1 %679  ;;  %v1439_v32 = vshrl.u32 %v2253_v21, 16  ;;  %v1442_v33 = vshll.u32 %v2253_v21, 16  ;;  %v2192_v21 = vld [vmem:[%s2546_s26 + $0x50] sm:$0x1] }
  0xdb   : > { %716 = vst.msk [vmem:[#allocation2 + $0x30] sm:$0xf] %vm703_vm8, %v680_v28  ;;  %v678_v30 = vpop.permute.xlu0 %677  ;;  %v760_v34 = vpop.permute.xlu2 %759  ;;  %v1397_v28 = vor.u32 %v1396_v17, %v1393_v16  ;;  %v2297_v16 = vrot.slane %v2277_v7, 9 }
  0xdc   : > { %715 = vst.msk [vmem:[#allocation2 + $0x2c] sm:$0xf] %vm703_vm8, %v678_v30  ;;  %v1452_v30 = vshrl.u32 %v2254_v19, 16  ;;  %v1441_v43 = vrot.slane %v1439_v32, 4  ;;  %v1444_v44 = vrot.slane %v1442_v33, 5 }
  0xdd   : > { %805 = vst.msk [vmem:[#allocation2 + $0xc] sm:$0xf] %vm801_vm9, %v760_v34  ;;  %v1408_v34 = vrot.slane %v1407_v23, 4  ;;  %v1398_v38 = vrot.slane %v1397_v28, 4  ;;  %v978_v23 = vrot.slane %v976_v9, 4 }
  0xde   : > { %v1454_v40 = vrot.slane %v1452_v30, 4 }
  0xdf   : > { %v1403_v46 = vsel %vm2557_vm2, %v1398_v38, %v1402_v12  ;;  %v966_v12 = vshll.u32 %v2190_v1, 16  ;;  %v982_v38 = vshll.u32 %v2192_v21, 16 }
  0xe0   : > { %1769 = vrot.lane.b32.xlu1 %v1729_v35, %s2485_s7  ;;  %v1412_v35 = vrot.slane %v1410_v24, 5 }
  0xe1   : > { %1767 = vrot.lane.b32.xlu0 %v1726_v36, %s2485_s7  ;;  %1608 = vrot.lane.b32.xlu2 %v1557_v42, %s2484_s6  ;;  %v2255_v42 = vld [vmem:[%s2546_s26 + $0x38] sm:$0x1]  ;;  %v968_v30 = vrot.slane %v966_v12, 5 }
  0xe2   : > { %v686_v37 = vpop.permute.xlu1 %685  ;;  %v1458_v50 = vshll.u32 %v2255_v42, 16 }
  0xe3   : > { %719 = vst.msk [vmem:[#allocation2 + $0x3c] sm:$0xf] %vm703_vm8, %v686_v37  ;;  %v684_v49 = vpop.permute.xlu0 %683  ;;  %v766_v51 = vpop.permute.xlu2 %765  ;;  %v1413_v37 = vsel %vm2557_vm2, %v1408_v34, %v1412_v35  ;;  %v1712_v35 = vsel %vm2625_vm5, %v2297_v16, %v1711_v3 }
  0xe4   : > { %718 = vst.msk [vmem:[#allocation2 + $0x38] sm:$0xf] %vm703_vm8, %v684_v49  ;;  %v1455_v49 = vor.u32 %v1454_v40, %v1450_v39 }
  0xe5   : > { %808 = vst.msk [vmem:[#allocation2 + $0x18] sm:$0xf] %vm801_vm9, %v766_v51  ;;  %v2236_v51 = vld [vmem:[%s2546_s26 + $0x34] sm:$0xf] }
  0xe6   : > { %v1456_v56 = vrot.slane %v1455_v49, 4 }
  0xe8   : > { %1203 = vrot.lane.b32.xlu1 %v1150_v52, %s2482_s4  ;;  %v1445_v52 = vor.u32 %v1444_v44, %v1441_v43 }
  0xe9   : > { %1777 = vrot.lane.b32.xlu0 %v1743_v54, %s2485_s7  ;;  %1775 = vrot.lane.b32.xlu2 %v1740_v57, %s2485_s7  ;;  %v1697_v54 = vrot.slane %v2272_v48, 5  ;;  %v1460_v57 = vrot.slane %v1458_v50, 5 }
  0xea   : > { %v758_v61 = vpop.permute.xlu1 %757  ;;  %v1446_v62 = vrot.slane %v1445_v52, 4 }
  0xeb   : > { %804 = vst.msk [vmem:[#allocation2 + $0x8] sm:$0xf] %vm801_vm9, %v758_v61  ;;  %v756_v0 = vpop.permute.xlu0 %755  ;;  %v772_v4 = vpop.permute.xlu2 %771  ;;  %v2279_v61 = vld [vmem:[%s2546_s26 + $0x38] sm:$0x1]  ;;  %v1698_v2 = vsel %vm2625_vm5, %v2295_v53, %v1697_v54  ;;  %v1461_v6 = vsel %vm2557_vm2, %v1456_v56, %v1460_v57  ;;  %v2214_v56 = vld [vmem:[%s2546_s26 + $0x48] sm:$0xe] }
  0xec   : > { %803 = vst.msk [vmem:[#allocation2 + $0x4] sm:$0xf] %vm801_vm9, %v756_v0  ;;  %v1451_v10 = vsel %vm2557_vm2, %v1446_v62, %v1450_v39  ;;  %v1714_v13 = vrot.slane %v2279_v61, 5 }
  0xed   : > { %811 = vst.msk [vmem:[#allocation2 + $0x24] sm:$0xf] %vm801_vm9, %v772_v4  ;;  %v1011_v4 = vshrl.u32 %v2196_v59, 16 }
  0xee   : > { %v1715_v32 = vsel %vm2625_vm5, %v1713_v15, %v1714_v13 }
  0xef   : > { %v1013_v17 = vrot.slane %v1011_v4, 4 }
  0xf0   : > { %1213 = vrot.lane.b32.xlu1 %v1167_v5, %s2482_s4  ;;  %v1014_v5 = vshll.u32 %v2196_v59, 16 }
  0xf1   : > { %1211 = vrot.lane.b32.xlu0 %v1164_v8, %s2482_s4  ;;  %1205 = vrot.lane.b32.xlu2 %v1153_v11, %s2482_s4  ;;  %v972_v8 = vshll.u32 %v2191_v63, 16  ;;  %v963_v11 = vshrl.u32 %v2190_v1, 16  ;;  %v2228_v63 = vrot.slane %v2214_v56, 9  ;;  %v2221_v1 = vld [vmem:[%s2546_s26 + $0x64] sm:$0xf]  ;;  %v2371_v56 = vld [vmem:[%s3333_s1 + $0x10] sm:$0xff] }
  0xf2   : > { %v764_v14 = vpop.permute.xlu1 %763  ;;  %v1198_v7 = vrot.slane %v2221_v1, 5 }
  0xf3   : > { %807 = vst.msk [vmem:[#allocation2 + $0x14] sm:$0xf] %vm801_vm9, %v764_v14  ;;  %v762_v18 = vpop.permute.xlu0 %761  ;;  %v778_v20 = vpop.permute.xlu2 %777  ;;  %v2273_v14 = vld [vmem:[%s2546_s26 + $0x20] sm:$0x1]  ;;  %v965_v29 = vrot.slane %v963_v11, 4 }
  0xf4   : > { %806 = vst.msk [vmem:[#allocation2 + $0x10] sm:$0xf] %vm801_vm9, %v762_v18  ;;  %v1016_v18 = vrot.slane %v1014_v5, 5  ;;  %v1700_v28 = vrot.slane %v2273_v14, 5  ;;  %v1200_v12 = vrot.slane %v1198_v7, 4 }
  0xf5   : > { %814 = vst.msk [vmem:[#allocation2 + $0x30] sm:$0xf] %vm801_vm9, %v778_v20  ;;  %v2197_v20 = vld [vmem:[%s2546_s26 + $0x64] sm:$0xf]  ;;  %v2268_v14 = vld [vmem:[%s2546_s26 + $0x6c] sm:$0xf] }
  0xf6   : > { %v1017_v33 = vor.u32 %v1016_v18, %v1013_v17  ;;  %v1020_v34 = vshll.u32 %v2197_v20, 16  ;;  %v1024_v39 = vshrl.u32 %v2197_v20, 16  ;;  %v2263_v17 = vld [vmem:[%s2546_s26 + $0x58] sm:$0xf]  ;;  %v2241_v20 = vld [vmem:[%s2546_s26 + $0x54] sm:$0xf] }
  0xf7   : > { %v1559_v21 = vshrl.u32 %v2268_v14, 16 }
  0xf8   : > { %1309 = vrot.lane.b32.xlu1 %v2235_v22, %s2483_s5  ;;  %v974_v22 = vrot.slane %v972_v8, 5  ;;  %v1018_v42 = vrot.slane %v1017_v33, 4  ;;  %v1022_v43 = vrot.slane %v1020_v34, 5  ;;  %v1026_v49 = vrot.slane %v1024_v39, 4  ;;  %v2222_v8 = vld [vmem:[%s2546_s26 + $0x68] sm:$0x1] }
  0xf9   : > { %1303 = vrot.lane.b32.xlu0 %v2232_v27, %s2483_s5  ;;  %1301 = vrot.lane.b32.xlu2 %v2231_v31, %s2483_s5  ;;  %v1699_v27 = vrot.slane %v1697_v54, 4  ;;  %v1201_v13 = vrot.slane %v2222_v8, 5  ;;  %v1561_v33 = vrot.slane %v1559_v21, 4  ;;  %v2264_v39 = vld [vmem:[%s2546_s26 + $0x5c] sm:$0x1] }
  0xfa   : > { %v770_v36 = vpop.permute.xlu1 %769  ;;  %v1023_v52 = vsel %vm2557_vm2, %v1018_v42, %v1022_v43  ;;  %v1027_v58 = vor.u32 %v1026_v49, %v1022_v43  ;;  %v2288_v8 = vld [vmem:[%s2546_s26 + $0x5c] sm:$0x1] }
  0xfb   : > { %810 = vst.msk [vmem:[#allocation2 + $0x20] sm:$0xf] %vm801_vm9, %v770_v36  ;;  %v768_v41 = vpop.permute.xlu0 %767  ;;  %v784_v45 = vpop.permute.xlu2 %783  ;;  %v979_v36 = vor.u32 %v978_v23, %v974_v22  ;;  %v1701_v40 = vsel %vm2625_vm5, %v1699_v27, %v1700_v28  ;;  %v1202_v23 = vsel %vm2625_vm5, %v1200_v12, %v1201_v13  ;;  %v1524_v27 = vshrl.u32 %v2263_v17, 16  ;;  %v1840_v28 = vld [vmem:[%s3333_s1 + $0x20] sm:$0xf] }
  0xfc   : > { %809 = vst.msk [vmem:[#allocation2 + $0x1c] sm:$0xf] %vm801_vm9, %v768_v41  ;;  %v969_v41 = vor.u32 %v968_v30, %v965_v29  ;;  %v2369_v13 = vld [vmem:[%s3333_s1] sm:$0xff] }
  0xfd   : > { %817 = vst.msk [vmem:[#allocation2 + $0x3c] sm:$0xf] %vm801_vm9, %v784_v45  ;;  %v980_v45 = vrot.slane %v979_v36, 4 }
  0xfe   : > { %v970_v48 = vrot.slane %v969_v41, 4  ;;  %v1526_v41 = vrot.slane %v1524_v27, 4  ;;  %v2202_v27 = vld [vmem:[%s2546_s26 + $0x18] sm:$0xe] }
 0x100   : > { %1584 = vrot.lane.b32.xlu1 %v1413_v37, %s2484_s6  ;;  %v984_v37 = vrot.slane %v982_v38, 5  ;;  %v975_v57 = vsel %vm2557_vm2, %v970_v48, %v974_v22  ;;  %v1562_v22 = vshll.u32 %v2268_v14, 16  ;;  %v2269_v38 = vld [vmem:[%s2546_s26 + $0x70] sm:$0xf] }
 0x101   : > { %1582 = vrot.lane.b32.xlu0 %v1403_v46, %s2484_s6  ;;  %1311 = vrot.lane.b32.xlu2 %v2236_v51, %s2483_s5  ;;  %v2215_v46 = vld [vmem:[%s2546_s26 + $0x4c] sm:$0xf]  ;;  %v2198_v51 = vld [vmem:[%s2546_s26 + $0x68] sm:$0x1]  ;;  %v1568_v49 = vshll.u32 %v2269_v38, 16 }
 0x102   : > { %v776_v55 = vpop.permute.xlu1 %775  ;;  %v1184_v53 = vrot.slane %v2215_v46, 5  ;;  %v985_v54 = vsel %vm2557_vm2, %v980_v45, %v984_v37  ;;  %v1030_v59 = vshll.u32 %v2198_v51, 16  ;;  %v1564_v34 = vrot.slane %v1562_v22, 5  ;;  %v2372_v46 = vld [vmem:[%s3333_s1 + $0x18] sm:$0xff] }
 0x103   : > { %813 = vst.msk [vmem:[#allocation2 + $0x2c] sm:$0xf] %vm801_vm9, %v776_v55  ;;  %v774_v60 = vpop.permute.xlu0 %773  ;;  %v1039_v0 = vpop.permute.xlu2 %1038  ;;  %v2216_v55 = vld [vmem:[%s2546_s26 + $0x50] sm:$0x1] }
 0x104   : > { %812 = vst.msk [vmem:[#allocation2 + $0x28] sm:$0xf] %vm801_vm9, %v774_v60  ;;  %v1186_v60 = vrot.slane %v1184_v53, 4  ;;  %v1187_v61 = vrot.slane %v2216_v55, 5  ;;  %v1032_v3 = vrot.slane %v1030_v59, 5  ;;  %v1565_v48 = vor.u32 %v1564_v34, %v1561_v33 }
 0x105   : > { %1085 = vst.msk [vmem:[#allocation2 + $0x8] sm:$0xf] %vm1082_vm10, %v1039_v0  ;;  %v2224_v33 = vrot.slane %v2202_v27, 9 }
 0x106   : > { %v1188_v5 = vsel %vm2625_vm5, %v1186_v60, %v1187_v61 }
 0x108   : > { %1751 = vrot.lane.b32.xlu1 %v1698_v2, %s2485_s7  ;;  %v1028_v2 = vrot.slane %v1027_v58, 4  ;;  %v1570_v58 = vrot.slane %v1568_v49, 5 }
 0x109   : > { %1592 = vrot.lane.b32.xlu0 %v1461_v6, %s2484_s6  ;;  %1590 = vrot.lane.b32.xlu2 %v1451_v10, %s2484_s6  ;;  %v1185_v6 = vsel %vm2625_vm5, %v2228_v63, %v1184_v53  ;;  %v2220_v10 = vld [vmem:[%s2546_s26 + $0x60] sm:$0xe]  ;;  %v1572_v53 = vshrl.u32 %v2269_v38, 16 }
 0x10a   : > { %v782_v19 = vpop.permute.xlu1 %781  ;;  %v1033_v9 = vsel %vm2557_vm2, %v1028_v2, %v1032_v3  ;;  %v2230_v16 = vrot.slane %v2220_v10, 9  ;;  %v2270_v3 = vld [vmem:[%s2546_s26 + $0x74] sm:$0x1] }
 0x10b   : > { %816 = vst.msk [vmem:[#allocation2 + $0x38] sm:$0xf] %vm801_vm9, %v782_v19  ;;  %v780_v24 = vpop.permute.xlu0 %779  ;;  %v1045_v31 = vpop.permute.xlu2 %1044  ;;  %v2262_v19 = vld [vmem:[%s2546_s26 + $0x54] sm:$0xf]  ;;  %v1574_v1 = vrot.slane %v1572_v53, 4  ;;  %v1578_v12 = vshll.u32 %v2270_v3, 16 }
 0x10c   : > { %815 = vst.msk [vmem:[#allocation2 + $0x34] sm:$0xf] %vm801_vm9, %v780_v24  ;;  %v1520_v24 = vshll.u32 %v2263_v17, 16  ;;  %v1199_v29 = vsel %vm2625_vm5, %v2230_v16, %v1198_v7  ;;  %v1511_v30 = vshrl.u32 %v2262_v19, 16  ;;  %v2251_v53 = vld [vmem:[%s2546_s26 + $0x28] sm:$0xf] }
 0x10d   : > { %1088 = vst.msk [vmem:[#allocation2 + $0x14] sm:$0xf] %vm1082_vm10, %v1045_v31  ;;  %v1514_v31 = vshll.u32 %v2262_v19, 16  ;;  %v2293_v19 = vld [vmem:[%s2546_s26 + $0x70] sm:$0xf]  ;;  %v1580_v21 = vrot.slane %v1578_v12, 5 }
 0x10e   : > { %v1513_v43 = vrot.slane %v1511_v30, 4  ;;  %v2294_v30 = vld [vmem:[%s2546_s26 + $0x74] sm:$0x1]  ;;  %v2237_v12 = vld [vmem:[%s2546_s26 + $0x3c] sm:$0xf] }
 0x10f   : > { %v1749_v38 = vrot.slane %v2294_v30, 5 }
 0x110   : > { %1761 = vrot.lane.b32.xlu1 %v1715_v32, %s2485_s7  ;;  %v1914_v32 = vunpack.c.l.b16 %v1840_v28  ;;  %v2203_v28 = vld [vmem:[%s2546_s26 + $0x1c] sm:$0xf] }
 0x111   : > { %1759 = vrot.lane.b32.xlu0 %v1712_v35, %s2485_s7  ;;  %1753 = vrot.lane.b32.xlu2 %v1701_v40, %s2485_s7  ;;  %v3064_v40 = vrot.slane %v1520_v24, 5  ;;  %v1156_v34 = vrot.slane %v2203_v28, 5  ;;  %v2258_v28 = vld [vmem:[%s2546_s26 + $0x44] sm:$0x1] }
 0x112   : > { %v1037_v44 = vpop.permute.xlu1 %1036  ;;  %v1919_v35 = vpack.c.b16 %v1914_v32, %v1914_v32  ;;  %v2292_v32 = vld [vmem:[%s2546_s26 + $0x6c] sm:$0xe] }
 0x113   : > { %1084 = vst.msk [vmem:[#allocation2 + $0x4] sm:$0xf] %vm1082_vm10, %v1037_v44  ;;  %v1035_v47 = vpop.permute.xlu0 %1034  ;;  %v1051_v50 = vpop.permute.xlu2 %1050  ;;  %v1516_v44 = vrot.slane %v1514_v31, 5  ;;  %v1527_v51 = vor.u32 %v1526_v41, %v3064_v40  ;;  %v2302_v41 = vrot.slane %v2292_v32, 9 }
 0x114   : > { %1083 = vst.msk [vmem:[#allocation2] sm:$0xf] %vm1082_vm10, %v1035_v47  ;;  %v1951_v45 = vsel %vm1949_vm11, %v1919_v35, 0  ;;  %v2246_v47 = vld [vmem:[%s2546_s26 + $0x70] sm:$0xf] }
 0x115   : > { %1091 = vst.msk [vmem:[#allocation2 + $0x20] sm:$0xf] %vm1082_vm10, %v1051_v50  ;;  %2374 = vmatpush.bf16.msra.mxu2 %v1951_v45  ;;  %2375 = vmatpush.bf16.msra.mxu3 %v1951_v45  ;;  %v2245_v50 = vld [vmem:[%s2546_s26 + $0x6c] sm:$0xf]  ;;  %v1517_v55 = vor.u32 %v1516_v44, %v1513_v43  ;;  %v1528_v60 = vrot.slane %v1527_v51, 4  ;;  %v1157_v43 = vsel %vm2625_vm5, %v2224_v33, %v1156_v34 }
 0x116   : > { %1956 = vmatpush.bf16.msra.mxu0 %v1951_v45  ;;  %2373 = vmatpush.bf16.msra.mxu1 %v1951_v45 }
 0x118   : > { %1062 = vrot.lane.b32.xlu1 %v1023_v52, %s2481_s30  ;;  %v1530_v52 = vshll.u32 %v2264_v39, 16  ;;  %v2209_v39 = vld [vmem:[%s2546_s26 + $0x34] sm:$0xf] }
 0x119   : > { %1056 = vrot.lane.b32.xlu0 %v985_v54, %s2481_s30  ;;  %1054 = vrot.lane.b32.xlu2 %v975_v57, %s2481_s30  ;;  %v2242_v54 = vld [vmem:[%s2546_s26 + $0x58] sm:$0xf]  ;;  %v1566_v57 = vrot.slane %v1565_v48, 4  ;;  %v1170_v44 = vrot.slane %v2209_v39, 5  ;;  %v2204_v48 = vld [vmem:[%s2546_s26 + $0x20] sm:$0x1] }
 0x11a   : > { %v1043_v62 = vpop.permute.xlu1 %1042  ;;  %2377 = vmatpush.bf16.msra.mxu2 %v2372_v46  ;;  %2378 = vmatpush.bf16.msra.mxu3 %v2372_v46  ;;  %v1532_v61 = vrot.slane %v1530_v52, 5  ;;  %v2274_v39 = vld [vmem:[%s2546_s26 + $0x24] sm:$0xe] }
 0x11b   : > { %1087 = vst.msk [vmem:[#allocation2 + $0x10] sm:$0xf] %vm1082_vm10, %v1043_v62  ;;  %v1041_v0 = vpop.permute.xlu0 %1040  ;;  %v1061_v4 = vpop.permute.xlu2 %1060  ;;  %v2287_v62 = vld [vmem:[%s2546_s26 + $0x58] sm:$0xf]  ;;  %1957 = vmatpush.bf16.msra.mxu0 %v2372_v46  ;;  %2376 = vmatpush.bf16.msra.mxu1 %v2372_v46  ;;  %v2208_v46 = vld [vmem:[%s2546_s26 + $0x30] sm:$0xe] }
 0x11c   : > { %1086 = vst.msk [vmem:[#allocation2 + $0xc] sm:$0xf] %vm1082_vm10, %v1041_v0  ;;  %v1518_v0 = vrot.slane %v1517_v55, 4  ;;  %v1533_v7 = vsel %vm2557_vm2, %v1528_v60, %v1532_v61  ;;  %v1172_v49 = vrot.slane %v1170_v44, 4  ;;  %v2226_v52 = vrot.slane %v2208_v46, 9 }
 0x11d   : > { %1096 = vst.msk [vmem:[#allocation2 + $0x34] sm:$0xf] %vm1082_vm10, %v1061_v4  ;;  %v2370_v4 = vld [vmem:[%s3333_s1 + $0x8] sm:$0xff]  ;;  %v1158_v55 = vrot.slane %v1156_v34, 4  ;;  %v1424_v60 = vshll.u32 %v2251_v53, 16  ;;  %v1428_v61 = vshrl.u32 %v2251_v53, 16 }
 0x11e   : > { %2380 = vmatpush.bf16.msra.mxu2 %v2371_v56  ;;  %2381 = vmatpush.bf16.msra.mxu3 %v2371_v56  ;;  %v1523_v10 = vsel %vm2557_vm2, %v1518_v0, %v3064_v40 }
 0x11f   : > { %1958 = vmatpush.bf16.msra.mxu0 %v2371_v56  ;;  %2379 = vmatpush.bf16.msra.mxu1 %v2371_v56  ;;  %v1159_v56 = vrot.slane %v2204_v48, 5  ;;  %v1430_v3 = vrot.slane %v1428_v61, 4 }
 0x120   : > { %1225 = vrot.lane.b32.xlu1 %v1188_v5, %s2482_s4  ;;  %v1571_v5 = vsel %vm2557_vm2, %v1566_v57, %v1570_v58  ;;  %v2250_v57 = vld [vmem:[%s2546_s26 + $0x24] sm:$0xf] }
 0x121   : > { %1223 = vrot.lane.b32.xlu0 %v1185_v6, %s2482_s4  ;;  %1064 = vrot.lane.b32.xlu2 %v1033_v9, %s2481_s30  ;;  %v1732_v6 = vrot.slane %v2287_v62, 5  ;;  %v2286_v9 = vld [vmem:[%s2546_s26 + $0x54] sm:$0xe]  ;;  %v1171_v62 = vsel %vm2625_vm5, %v2226_v52, %v1170_v44  ;;  %v1418_v0 = vshll.u32 %v2250_v57, 16  ;;  %s226_s30 = sadd.s32 %s2149_s27, %s3353_s25 }
 0x122   : > { %v1049_v11 = vpop.permute.xlu1 %1048  ;;  %2383 = vmatpush.bf16.msra.mxu2 %v2370_v4  ;;  %2384 = vmatpush.bf16.msra.mxu3 %v2370_v4  ;;  %v2300_v17 = vrot.slane %v2286_v9, 9  ;;  %v2257_v9 = vld [vmem:[%s2546_s26 + $0x40] sm:$0xf] }
 0x123   : > { %1090 = vst.msk [vmem:[#allocation2 + $0x1c] sm:$0xf] %vm1082_vm10, %v1049_v11  ;;  %v1047_v15 = vpop.permute.xlu0 %1046  ;;  %v1228_v18 = vpop.permute.xlu2 %1227  ;;  %v1575_v11 = vor.u32 %v1574_v1, %v1570_v58  ;;  %v1734_v14 = vrot.slane %v1732_v6, 4  ;;  %1959 = vmatpush.bf16.msra.mxu0 %v2370_v4  ;;  %2382 = vmatpush.bf16.msra.mxu1 %v2370_v4  ;;  %v1160_v1 = vsel %vm2625_vm5, %v1158_v55, %v1159_v56 }
 0x124   : > { %1089 = vst.msk [vmem:[#allocation2 + $0x18] sm:$0xf] %vm1082_vm10, %v1047_v15  ;;  %v1735_v15 = vrot.slane %v2288_v8, 5  ;;  %v1733_v24 = vsel %vm2625_vm5, %v2300_v17, %v1732_v6  ;;  %v1472_v17 = vshll.u32 %v2257_v9, 16 }
 0x126   : > { %2386 = vmatpush.bf16.msra.mxu2 %v2369_v13  ;;  %2387 = vmatpush.bf16.msra.mxu3 %v2369_v13 }
 0x127   : > { %1960 = vmatpush.bf16.msra.mxu0 %v2369_v13  ;;  %2385 = vmatpush.bf16.msra.mxu1 %v2369_v13 }
 0x128   : > { %1321 = vrot.lane.b32.xlu1 %v2241_v20, %s2483_s5  ;;  %v1576_v20 = vrot.slane %v1575_v11, 4  ;;  %v2256_v11 = vld [vmem:[%s2546_s26 + $0x3c] sm:$0xf] }
 0x129   : > { %1233 = vrot.lane.b32.xlu0 %v1202_v23, %s2482_s4  ;;  %1231 = vrot.lane.b32.xlu2 %v1199_v29, %s2482_s4  ;;  %v1736_v23 = vsel %vm2625_vm5, %v1734_v14, %v1735_v15  ;;  %v1746_v29 = vrot.slane %v2293_v19, 5  ;;  %v2234_v15 = vld [vmem:[%s2546_s26 + $0x28] sm:$0xf]  ;;  %v2233_v19 = vld [vmem:[%s2546_s26 + $0x24] sm:$0xf] }
 0x12a   : > { %v1059_v36 = vpop.permute.xlu1 %1058  ;;  %v1581_v31 = vsel %vm2557_vm2, %v1576_v20, %v1580_v21  ;;  %v1463_v20 = vshrl.u32 %v2256_v11, 16  ;;  %v1466_v21 = vshll.u32 %v2256_v11, 16 }
 0x12b   : > { %1095 = vst.msk [vmem:[#allocation2 + $0x30] sm:$0xf] %vm1082_vm10, %v1059_v36  ;;  %v1053_v42 = vpop.permute.xlu0 %1052  ;;  %v1320_v37 = vpop.permute.xlu2 %1319  ;;  %v1748_v36 = vrot.slane %v1746_v29, 4 }
 0x12c   : > { %1092 = vst.msk [vmem:[#allocation2 + $0x24] sm:$0xf] %vm1082_vm10, %v1053_v42  ;;  %v1465_v33 = vrot.slane %v1463_v20, 4  ;;  %v1468_v34 = vrot.slane %v1466_v21, 5 }
 0x12d   : > { %1264 = vst.msk [vmem:[#allocation2 + $0x30] sm:$0xf] %vm1251_vm12, %v1228_v18  ;;  %v1750_v45 = vsel %vm2625_vm5, %v1748_v36, %v1749_v38 }
 0x12e   : > { %v1469_v44 = vor.u32 %v1468_v34, %v1465_v33 }
 0x130   : > { %1331 = vrot.lane.b32.xlu1 %v2246_v47, %s2483_s5  ;;  %v1747_v47 = vsel %vm2625_vm5, %v2302_v41, %v1746_v29  ;;  %v1474_v29 = vrot.slane %v1472_v17, 5  ;;  %v1470_v52 = vrot.slane %v1469_v44, 4 }
 0x131   : > { %1329 = vrot.lane.b32.xlu0 %v2245_v50, %s2483_s5  ;;  %1323 = vrot.lane.b32.xlu2 %v2242_v54, %s2483_s5 }
 0x132   : > { %v1222_v59 = vpop.permute.xlu1 %1221 }
 0x133   : > { %1261 = vst.msk [vmem:[#allocation2 + $0x24] sm:$0xf] %vm1251_vm12, %v1222_v59  ;;  %v1220_v63 = vpop.permute.xlu0 %1219  ;;  %v1599_v2 = vpop.permute.xlu2 %1598 }
 0x134   : > { %1260 = vst.msk [vmem:[#allocation2 + $0x20] sm:$0xf] %vm1251_vm12, %v1220_v63  ;;  %v1415_v63 = vshrl.u32 %v2250_v57, 16  ;;  %v2282_v57 = vld [vmem:[%s2546_s26 + $0x44] sm:$0x1] }
 0x135   : > { %1359 = vst.msk [vmem:[#allocation2 + $0x24] sm:$0xf] %vm1349_vm13, %v1320_v37  ;;  %v2210_v37 = vld [vmem:[%s2546_s26 + $0x38] sm:$0x1] }
 0x136   : > { %v1173_v50 = vrot.slane %v2210_v37, 5  ;;  %v1417_v6 = vrot.slane %v1415_v63, 4 }
 0x138   : > { %1610 = vrot.lane.b32.xlu1 %v1571_v5, %s2484_s6  ;;  %v1174_v59 = vsel %vm2625_vm5, %v1172_v49, %v1173_v50  ;;  %v2252_v5 = vld [vmem:[%s2546_s26 + $0x2c] sm:$0x1]  ;;  %v2281_v49 = vld [vmem:[%s2546_s26 + $0x40] sm:$0xf] }
 0x139   : > { %1604 = vrot.lane.b32.xlu0 %v1533_v7, %s2484_s6  ;;  %1602 = vrot.lane.b32.xlu2 %v1523_v10, %s2484_s6  ;;  %v1420_v7 = vrot.slane %v1418_v0, 5  ;;  %v1434_v14 = vshll.u32 %v2252_v5, 16  ;;  %v1718_v55 = vrot.slane %v2281_v49, 5 }
 0x13a   : > { %v1318_v16 = vpop.permute.xlu1 %1317 }
 0x13b   : > { %1358 = vst.msk [vmem:[#allocation2 + $0x20] sm:$0xf] %vm1349_vm13, %v1318_v16  ;;  %v1230_v18 = vpop.permute.xlu0 %1229  ;;  %v1609_v22 = vpop.permute.xlu2 %1608  ;;  %v1421_v16 = vor.u32 %v1420_v7, %v1417_v6  ;;  %v1720_v61 = vrot.slane %v1718_v55, 4 }
 0x13c   : > { %1265 = vst.msk [vmem:[#allocation2 + $0x34] sm:$0xf] %vm1251_vm12, %v1230_v18  ;;  %v1476_v18 = vshrl.u32 %v2257_v9, 16 }
 0x13d   : > { %1639 = vst.msk [vmem:[#allocation2 + $0x20] sm:$0xf] %vm1630_vm14, %v1599_v2  ;;  %v1426_v2 = vrot.slane %v1424_v60, 5  ;;  %v1422_v27 = vrot.slane %v1421_v16, 4  ;;  %v2276_v60 = vld [vmem:[%s2546_s26 + $0x2c] sm:$0x1] }
 0x13e   : > { %v1478_v30 = vrot.slane %v1476_v18, 4 }
 0x13f   : > { %v1431_v13 = vor.u32 %v1430_v3, %v1426_v2  ;;  %v1427_v38 = vsel %vm2557_vm2, %v1422_v27, %v1426_v2  ;;  %v1707_v3 = vrot.slane %v2276_v60, 5 }
 0x140   : > { %1773 = vrot.lane.b32.xlu1 %v1736_v23, %s2485_s7  ;;  %v1436_v23 = vrot.slane %v1434_v14, 5  ;;  %v1479_v41 = vor.u32 %v1478_v30, %v1474_v29 }
 0x141   : > { %1771 = vrot.lane.b32.xlu0 %v1733_v24, %s2485_s7  ;;  %1612 = vrot.lane.b32.xlu2 %v1581_v31, %s2484_s6 }
 0x142   : > { %v1328_v35 = vpop.permute.xlu1 %1327 }
 0x143   : > { %1363 = vst.msk [vmem:[#allocation2 + $0x34] sm:$0xf] %vm1349_vm13, %v1328_v35  ;;  %v1326_v40 = vpop.permute.xlu0 %1325  ;;  %v1776_v42 = vpop.permute.xlu2 %1775 }
 0x144   : > { %1362 = vst.msk [vmem:[#allocation2 + $0x30] sm:$0xf] %vm1349_vm13, %v1326_v40  ;;  %v2275_v40 = vld [vmem:[%s2546_s26 + $0x28] sm:$0xf] }
 0x145   : > { %1644 = vst.msk [vmem:[#allocation2 + $0x34] sm:$0xf] %vm1630_vm14, %v1609_v22  ;;  %v1432_v22 = vrot.slane %v1431_v13, 4  ;;  %v1704_v37 = vrot.slane %v2275_v40, 5 }
 0x147   : > { %v1437_v36 = vsel %vm2557_vm2, %v1432_v22, %v1436_v23  ;;  %v1706_v2 = vrot.slane %v1704_v37, 4 }
 0x148   : > { %1207 = vrot.lane.b32.xlu1 %v1157_v43, %s2482_s4  ;;  %v2238_v43 = vld [vmem:[%s2546_s26 + $0x40] sm:$0xf] }
 0x149   : > { %1781 = vrot.lane.b32.xlu0 %v1750_v45, %s2485_s7  ;;  %1779 = vrot.lane.b32.xlu2 %v1747_v47, %s2485_s7  ;;  %v2296_v45 = vrot.slane %v2274_v39, 9  ;;  %v1480_v47 = vrot.slane %v1479_v41, 4  ;;  %v1708_v6 = vsel %vm2625_vm5, %v1706_v2, %v1707_v3 }
 0x14a   : > { %v1607_v51 = vpop.permute.xlu1 %1606 }
 0x14b   : > { %1643 = vst.msk [vmem:[#allocation2 + $0x30] sm:$0xf] %vm1630_vm14, %v1607_v51  ;;  %v1601_v54 = vpop.permute.xlu0 %1600  ;;  %v1206_v58 = vpop.permute.xlu2 %1205 }
 0x14c   : > { %1640 = vst.msk [vmem:[#allocation2 + $0x24] sm:$0xf] %vm1630_vm14, %v1601_v54  ;;  %v1705_v54 = vsel %vm2625_vm5, %v2296_v45, %v1704_v37 }
 0x14d   : > { %1812 = vst.msk [vmem:[#allocation2 + $0x30] sm:$0xf] %vm1799_vm15, %v1776_v42  ;;  %v1482_v42 = vshll.u32 %v2258_v28, 16 }
 0x14e   : > { %1253 = vst.msk [vmem:[#allocation2 + $0x4] sm:$0xf] %vm1251_vm12, %v1206_v58  ;;  %v2280_v58 = vld [vmem:[%s2546_s26 + $0x3c] sm:$0xe]  ;;  %s2147_s26 = sshll.u32 %s3353_s25, 3 }
 0x14f   : > { %v1484_v48 = vrot.slane %v1482_v42, 5  ;;  %v2298_v0 = vrot.slane %v2280_v58, 9  ;;  %s3257_s12 = scalar_lea.vmem %s3334_s2, %s2147_s26 }
 0x150   : > { %1217 = vrot.lane.b32.xlu1 %v1174_v59, %s2482_s4  ;;  %v1475_v59 = vsel %vm2557_vm2, %v1470_v52, %v1474_v29  ;;  %v1849_v52 = vld [vmem:[%s3257_s12 + $0x40] sm:$0xff] }
 0x151   : > { %1215 = vrot.lane.b32.xlu0 %v1171_v62, %s2482_s4  ;;  %1209 = vrot.lane.b32.xlu2 %v1160_v1, %s2482_s4  ;;  %v1485_v56 = vsel %vm2557_vm2, %v1480_v47, %v1484_v48  ;;  %v1721_v62 = vrot.slane %v2282_v57, 5  ;;  %v1719_v5 = vsel %vm2625_vm5, %v2298_v0, %v1718_v55  ;;  %s2150_s4 = sshll.u32 %s226_s30, 3  ;;  %v1853_v60 = vld [vmem:[%s3257_s12 + $0x60] sm:$0xff] }
 0x152   : > { %v1770_v4 = vpop.permute.xlu1 %1769 }
 0x153   : > { %1809 = vst.msk [vmem:[#allocation2 + $0x24] sm:$0xf] %vm1799_vm15, %v1770_v4  ;;  %v1768_v8 = vpop.permute.xlu0 %1767  ;;  %v1302_v10 = vpop.permute.xlu2 %1301  ;;  %v1722_v4 = vsel %vm2625_vm5, %v1720_v61, %v1721_v62 }
 0x154   : > { %1808 = vst.msk [vmem:[#allocation2 + $0x20] sm:$0xf] %vm1799_vm15, %v1768_v8 }
 0x158   : > { %1313 = vrot.lane.b32.xlu1 %v2237_v12, %s2483_s5 }
 0x159   : > { %1307 = vrot.lane.b32.xlu0 %v2234_v15, %s2483_s5  ;;  %1305 = vrot.lane.b32.xlu2 %v2233_v19, %s2483_s5 }
 0x15a   : > { %v1204_v24 = vpop.permute.xlu1 %1203 }
 0x15b   : > { %1252 = vst.msk [vmem:[#allocation2] sm:$0xf] %vm1251_vm12, %v1204_v24  ;;  %v1778_v31 = vpop.permute.xlu0 %1777  ;;  %v2365_v32 = vld [vmem:[#allocation2 + $0x20] sm:$0xff]  ;;  %v1312_v35 = vpop.permute.xlu2 %1311 }
 0x15c   : > { %1813 = vst.msk [vmem:[#allocation2 + $0x34] sm:$0xf] %vm1799_vm15, %v1778_v31  ;;  %2355 = vmatmul.msk.bf16.vlgmr.msra.gmra.mxu2 %vm1924_vm0, %v2365_v32 }
 0x15d   : > { %1350 = vst.msk [vmem:[#allocation2] sm:$0xf] %vm1349_vm13, %v1302_v10 }
 0x160   : > { %1588 = vrot.lane.b32.xlu1 %v1437_v36, %s2484_s6 }
 0x161   : > { %1586 = vrot.lane.b32.xlu0 %v1427_v38, %s2484_s6  ;;  %1315 = vrot.lane.b32.xlu2 %v2238_v43, %s2483_s5 }
 0x162   : > { %v1214_v46 = vpop.permute.xlu1 %1213 }
 0x163   : > { %1257 = vst.msk [vmem:[#allocation2 + $0x14] sm:$0xf] %vm1251_vm12, %v1214_v46  ;;  %v1212_v50 = vpop.permute.xlu0 %1211  ;;  %v2367_v51 = vld [vmem:[#allocation2 + $0x30] sm:$0xff]  ;;  %v1591_v53 = vpop.permute.xlu2 %1590 }
 0x164   : > { %1256 = vst.msk [vmem:[#allocation2 + $0x10] sm:$0xf] %vm1251_vm12, %v1212_v50  ;;  %2357 = vmatmul.msk.bf16.vlgmr.msra.gmra.mxu3 %vm1924_vm0, %v2367_v51 }
 0x165   : > { %1355 = vst.msk [vmem:[#allocation2 + $0x14] sm:$0xf] %vm1349_vm13, %v1312_v35 }
 0x168   : > { %1755 = vrot.lane.b32.xlu1 %v1705_v54, %s2485_s7 }
 0x169   : > { %1596 = vrot.lane.b32.xlu0 %v1485_v56, %s2484_s6  ;;  %1594 = vrot.lane.b32.xlu2 %v1475_v59, %s2484_s6  ;;  %s3264_s6 = scalar_lea.vmem %s3335_s3, %s2150_s4  ;;  %v1850_v59 = vld [vmem:[%s3257_s12 + $0x48] sm:$0xff] }
 0x16a   : > { %v1310_v63 = vpop.permute.xlu1 %1309 }
 0x16b   : > { %1354 = vst.msk [vmem:[#allocation2 + $0x10] sm:$0xf] %vm1349_vm13, %v1310_v63  ;;  %v1304_v1 = vpop.permute.xlu0 %1303  ;;  %v1754_v25 = vpop.permute.xlu2 %1753 }
 0x16c   : > { %1351 = vst.msk [vmem:[#allocation2 + $0x4] sm:$0xf] %vm1349_vm13, %v1304_v1 }
 0x16d   : > { %1635 = vst.msk [vmem:[#allocation2 + $0x10] sm:$0xf] %vm1630_vm14, %v1591_v53 }
 0x170   : > { %1765 = vrot.lane.b32.xlu1 %v1722_v4, %s2485_s7 }
 0x171   : > { %1763 = vrot.lane.b32.xlu0 %v1719_v5, %s2485_s7  ;;  %1757 = vrot.lane.b32.xlu2 %v1708_v6, %s2485_s7 }
 0x172   : > { %v1585_v7 = vpop.permute.xlu1 %1584 }
 0x173   : > { %1632 = vst.msk [vmem:[#allocation2 + $0x4] sm:$0xf] %vm1630_vm14, %v1585_v7  ;;  %v1583_v8 = vpop.permute.xlu0 %1582  ;;  %v1055_v9 = vpop.permute.xlu2 %1054  ;;  %v1841_v7 = vld [vmem:[%s3257_s12] sm:$0xff] }
 0x174   : > { %1631 = vst.msk [vmem:[#allocation2] sm:$0xf] %vm1630_vm14, %v1583_v8 }
 0x175   : > { %1801 = vst.msk [vmem:[#allocation2 + $0x4] sm:$0xf] %vm1799_vm15, %v1754_v25  ;;  %v1854_v25 = vld [vmem:[%s3257_s12 + $0x68] sm:$0xff] }
 0x176   : > { %1093 = vst.msk [vmem:[#allocation2 + $0x28] sm:$0xf] %vm1082_vm10, %v1055_v9 }
 0x17a   : > { %v1752_v10 = vpop.permute.xlu1 %1751 }
 0x17b   : > { %1800 = vst.msk [vmem:[#allocation2] sm:$0xf] %vm1799_vm15, %v1752_v10  ;;  %v1593_v26 = vpop.permute.xlu0 %1592  ;;  %v1065_v11 = vpop.permute.xlu2 %1064 }
 0x17c   : > { %1636 = vst.msk [vmem:[#allocation2 + $0x14] sm:$0xf] %vm1630_vm14, %v1593_v26  ;;  %v1842_v26 = vld [vmem:[%s3257_s12 + $0x8] sm:$0xff] }
 0x17d   : > { %1098 = vst.msk [vmem:[#allocation2 + $0x3c] sm:$0xf] %vm1082_vm10, %v1065_v11  ;;  %v1845_v11 = vld [vmem:[%s3257_s12 + $0x20] sm:$0xff] }
 0x182   : > { %v1762_v12 = vpop.permute.xlu1 %1761  ;;  %v2361_v13 = vld [vmem:[#allocation2] sm:$0xff] }
 0x183   : > { %1805 = vst.msk [vmem:[#allocation2 + $0x14] sm:$0xf] %vm1799_vm15, %v1762_v12  ;;  %v1760_v14 = vpop.permute.xlu0 %1759  ;;  %2351 = vmatmul.msk.bf16.vlgmr.msra.gmra.mxu0 %vm1924_vm0, %v2361_v13  ;;  %v1232_v15 = vpop.permute.xlu2 %1231 }
 0x184   : > { %1804 = vst.msk [vmem:[#allocation2 + $0x10] sm:$0xf] %vm1799_vm15, %v1760_v14 }
 0x18a   : > { %v1063_v16 = vpop.permute.xlu1 %1062 }
 0x18b   : > { %1097 = vst.msk [vmem:[#allocation2 + $0x38] sm:$0xf] %vm1082_vm10, %v1063_v16  ;;  %v1057_v17 = vpop.permute.xlu0 %1056  ;;  %v2363_v18 = vld [vmem:[#allocation2 + $0x10] sm:$0xff]  ;;  %v1324_v19 = vpop.permute.xlu2 %1323 }
 0x18c   : > { %1094 = vst.msk [vmem:[#allocation2 + $0x2c] sm:$0xf] %vm1082_vm10, %v1057_v17  ;;  %2353 = vmatmul.msk.bf16.vlgmr.msra.gmra.mxu1 %vm1924_vm0, %v2363_v18  ;;  %v1846_v18 = vld [vmem:[%s3257_s12 + $0x28] sm:$0xff] }
 0x18d   : > { %1266 = vst.msk [vmem:[#allocation2 + $0x38] sm:$0xf] %vm1251_vm12, %v1232_v15 }
 0x192   : > { %v1226_v20 = vpop.permute.xlu1 %1225 }
 0x193   : > { %1263 = vst.msk [vmem:[#allocation2 + $0x2c] sm:$0xf] %vm1251_vm12, %v1226_v20  ;;  %v1224_v21 = vpop.permute.xlu0 %1223  ;;  %v1603_v22 = vpop.permute.xlu2 %1602 }
 0x194   : > { %1262 = vst.msk [vmem:[#allocation2 + $0x28] sm:$0xf] %vm1251_vm12, %v1224_v21 }
 0x195   : > { %1361 = vst.msk [vmem:[#allocation2 + $0x2c] sm:$0xf] %vm1349_vm13, %v1324_v19 }
 0x19a   : > { %v1322_v23 = vpop.permute.xlu1 %1321 }
 0x19b   : > { %1360 = vst.msk [vmem:[#allocation2 + $0x28] sm:$0xf] %vm1349_vm13, %v1322_v23  ;;  %v1234_v24 = vpop.permute.xlu0 %1233  ;;  %v1613_v27 = vpop.permute.xlu2 %1612 }
 0x19c   : > { %1267 = vst.msk [vmem:[#allocation2 + $0x3c] sm:$0xf] %vm1251_vm12, %v1234_v24 }
 0x19d   : > { %1641 = vst.msk [vmem:[#allocation2 + $0x28] sm:$0xf] %vm1630_vm14, %v1603_v22  ;;  %v1851_v22 = vld [vmem:[%s3257_s12 + $0x50] sm:$0xff] }
 0x1a2   : > { %v1332_v28 = vpop.permute.xlu1 %1331 }
 0x1a3   : > { %1365 = vst.msk [vmem:[#allocation2 + $0x3c] sm:$0xf] %vm1349_vm13, %v1332_v28  ;;  %v1330_v29 = vpop.permute.xlu0 %1329  ;;  %v1780_v30 = vpop.permute.xlu2 %1779  ;;  %v1852_v28 = vld [vmem:[%s3257_s12 + $0x58] sm:$0xff] }
 0x1a4   : > { %1364 = vst.msk [vmem:[#allocation2 + $0x38] sm:$0xf] %vm1349_vm13, %v1330_v29  ;;  %v1855_v29 = vld [vmem:[%s3257_s12 + $0x70] sm:$0xff] }
 0x1a5   : > { %1646 = vst.msk [vmem:[#allocation2 + $0x3c] sm:$0xf] %vm1630_vm14, %v1613_v27 }
 0x1aa   : > { %v1611_v31 = vpop.permute.xlu1 %1610 }
 0x1ab   : > { %1645 = vst.msk [vmem:[#allocation2 + $0x38] sm:$0xf] %vm1630_vm14, %v1611_v31  ;;  %v1605_v32 = vpop.permute.xlu0 %1604  ;;  %v1210_v33 = vpop.permute.xlu2 %1209 }
 0x1ac   : > { %1642 = vst.msk [vmem:[#allocation2 + $0x2c] sm:$0xf] %vm1630_vm14, %v1605_v32 }
 0x1ad   : > { %1814 = vst.msk [vmem:[#allocation2 + $0x38] sm:$0xf] %vm1799_vm15, %v1780_v30 }
 0x1ae   : > { %1255 = vst.msk [vmem:[#allocation2 + $0xc] sm:$0xf] %vm1251_vm12, %v1210_v33 }
 0x1b2   : > { %v1774_v34 = vpop.permute.xlu1 %1773 }
 0x1b3   : > { %1811 = vst.msk [vmem:[#allocation2 + $0x2c] sm:$0xf] %vm1799_vm15, %v1774_v34  ;;  %v1772_v35 = vpop.permute.xlu0 %1771  ;;  %v1306_v36 = vpop.permute.xlu2 %1305 }
 0x1b4   : > { %1810 = vst.msk [vmem:[#allocation2 + $0x28] sm:$0xf] %vm1799_vm15, %v1772_v35 }
 0x1ba   : > { %v1208_v38 = vpop.permute.xlu1 %1207 }
 0x1bb   : > { %1254 = vst.msk [vmem:[#allocation2 + $0x8] sm:$0xf] %vm1251_vm12, %v1208_v38  ;;  %v1782_v39 = vpop.permute.xlu0 %1781  ;;  %v2366_v40 = vld [vmem:[#allocation2 + $0x28] sm:$0xff]  ;;  %v1316_v41 = vpop.permute.xlu2 %1315 }
 0x1bc   : > { %1815 = vst.msk [vmem:[#allocation2 + $0x3c] sm:$0xf] %vm1799_vm15, %v1782_v39  ;;  %2356 = vmatmul.msk.bf16.gmra.mxu2 %vm1924_vm0, %v2366_v40 }
 0x1bd   : > { %1352 = vst.msk [vmem:[#allocation2 + $0x8] sm:$0xf] %vm1349_vm13, %v1306_v36  ;;  %v1856_v36 = vld [vmem:[%s3257_s12 + $0x78] sm:$0xff] }
 0x1c2   : > { %v1218_v42 = vpop.permute.xlu1 %1217 }
 0x1c3   : > { %1259 = vst.msk [vmem:[#allocation2 + $0x1c] sm:$0xf] %vm1251_vm12, %v1218_v42  ;;  %v1216_v43 = vpop.permute.xlu0 %1215  ;;  %v2368_v44 = vld [vmem:[#allocation2 + $0x38] sm:$0xff]  ;;  %v1595_v45 = vpop.permute.xlu2 %1594 }
 0x1c4   : > { %1258 = vst.msk [vmem:[#allocation2 + $0x18] sm:$0xf] %vm1251_vm12, %v1216_v43  ;;  %2358 = vmatmul.msk.bf16.gmra.mxu3 %vm1924_vm0, %v2368_v44 }
 0x1c5   : > { %1357 = vst.msk [vmem:[#allocation2 + $0x1c] sm:$0xf] %vm1349_vm13, %v1316_v41  ;;  %v1843_v41 = vld [vmem:[%s3257_s12 + $0x10] sm:$0xff] }
 0x1ca   : > { %v1314_v37 = vpop.permute.xlu1 %1313 }
 0x1cb   : > { %1356 = vst.msk [vmem:[#allocation2 + $0x18] sm:$0xf] %vm1349_vm13, %v1314_v37  ;;  %v1308_v46 = vpop.permute.xlu0 %1307  ;;  %v1758_v48 = vpop.permute.xlu2 %1757  ;;  %v1847_v37 = vld [vmem:[%s3257_s12 + $0x30] sm:$0xff] }
 0x1cc   : > { %1353 = vst.msk [vmem:[#allocation2 + $0xc] sm:$0xf] %vm1349_vm13, %v1308_v46 }
 0x1cd   : > { %1637 = vst.msk [vmem:[#allocation2 + $0x18] sm:$0xf] %vm1630_vm14, %v1595_v45  ;;  %v1844_v45 = vld [vmem:[%s3257_s12 + $0x18] sm:$0xff] }
 0x1d2   : > { %v1589_v47 = vpop.permute.xlu1 %1588 }
 0x1d3   : > { %1634 = vst.msk [vmem:[#allocation2 + $0xc] sm:$0xf] %vm1630_vm14, %v1589_v47  ;;  %v1587_v49 = vpop.permute.xlu0 %1586 }
 0x1d4   : > { %1633 = vst.msk [vmem:[#allocation2 + $0x8] sm:$0xf] %vm1630_vm14, %v1587_v49 }
 0x1d5   : > { %1803 = vst.msk [vmem:[#allocation2 + $0xc] sm:$0xf] %vm1799_vm15, %v1758_v48 }
 0x1da   : > { %v1756_v50 = vpop.permute.xlu1 %1755 }
 0x1db   : > { %1802 = vst.msk [vmem:[#allocation2 + $0x8] sm:$0xf] %vm1799_vm15, %v1756_v50  ;;  %v1597_v51 = vpop.permute.xlu0 %1596 }
 0x1dc   : > { %1638 = vst.msk [vmem:[#allocation2 + $0x1c] sm:$0xf] %vm1630_vm14, %v1597_v51 }
 0x1df   : > { %v1982_v53 = vpop.f32.mrf.mxu2 }
 0x1e0   : > { %v1983_v54 = vadd.f32 %v1982_v53, %v1849_v52  ;;  %v1848_v52 = vld [vmem:[%s3257_s12 + $0x38] sm:$0xff] }
 0x1e2   : > { %v1766_v55 = vpop.permute.xlu1 %1765  ;;  %v2362_v56 = vld [vmem:[#allocation2 + $0x8] sm:$0xff]  ;;  %v2010_v57 = vmax.f32 %v1983_v54, 0.0 }
 0x1e3   : > { %1807 = vst.msk [vmem:[#allocation2 + $0x1c] sm:$0xf] %vm1799_vm15, %v1766_v55  ;;  %v1764_v58 = vpop.permute.xlu0 %1763  ;;  %2352 = vmatmul.msk.bf16.gmra.mxu0 %vm1924_vm0, %v2362_v56 }
 0x1e4   : > { %1806 = vst.msk [vmem:[#allocation2 + $0x18] sm:$0xf] %vm1799_vm15, %v1764_v58 }
 0x1e5   : > { %2027 = vst.msk [vmem:[%s3264_s6 + $0x40] sm:$0xff] %vm2018_vm1, %v2010_v57 }
 0x1e7   : > { %v1984_v61 = vpop.f32.mrf.mxu2  ;;  %v1992_v62 = vpop.f32.mrf.mxu3 }
 0x1e8   : > { %v1985_v63 = vadd.f32 %v1984_v61, %v1850_v59  ;;  %v1993_v0 = vadd.f32 %v1992_v62, %v1853_v60 }
 0x1ea   : > { %v2011_v1 = vmax.f32 %v1985_v63, 0.0  ;;  %v2014_v2 = vmax.f32 %v1993_v0, 0.0 }
 0x1eb   : > { %v2364_v3 = vld [vmem:[#allocation2 + $0x18] sm:$0xff] }
 0x1ec   : > { %2028 = vst.msk [vmem:[%s3264_s6 + $0x48] sm:$0xff] %vm2018_vm1, %v2011_v1  ;;  %2354 = vmatmul.msk.bf16.gmra.mxu1 %vm1924_vm0, %v2364_v3 }
 0x1ed   : > { %2031 = vst.msk [vmem:[%s3264_s6 + $0x60] sm:$0xff] %vm2018_vm1, %v2014_v2 }
 0x1ef   : > { %v1994_v4 = vpop.f32.mrf.mxu3 }
 0x1f0   : > { %v1995_v5 = vadd.f32 %v1994_v4, %v1854_v25 }
 0x1f2   : > { %v2015_v6 = vmax.f32 %v1995_v5, 0.0 }
 0x1f4   : > { %2032 = vst.msk [vmem:[%s3264_s6 + $0x68] sm:$0xff] %vm2018_vm1, %v2015_v6 }
 0x200   : > { %v1962_v8 = vpop.f32.mrf.mxu0 }
 0x201   : > { %v1963_v9 = vadd.f32 %v1962_v8, %v1841_v7 }
 0x203   : > { %v2002_v10 = vmax.f32 %v1963_v9, 0.0 }
 0x205   : > { %2019 = vst.msk [vmem:[%s3264_s6] sm:$0xff] %vm2018_vm1, %v2002_v10 }
 0x208   : > { %v1964_v12 = vpop.f32.mrf.mxu0 }
 0x209   : > { %v1965_v13 = vadd.f32 %v1964_v12, %v1842_v26  ;;  %v1972_v14 = vpop.f32.mrf.mxu1 }
 0x20a   : > { %v1973_v15 = vadd.f32 %v1972_v14, %v1845_v11 }
 0x20b   : > { %v2003_v16 = vmax.f32 %v1965_v13, 0.0 }
 0x20c   : > { %v2006_v17 = vmax.f32 %v1973_v15, 0.0 }
 0x20d   : > { %2020 = vst.msk [vmem:[%s3264_s6 + $0x8] sm:$0xff] %vm2018_vm1, %v2003_v16 }
 0x20e   : > { %2023 = vst.msk [vmem:[%s3264_s6 + $0x20] sm:$0xff] %vm2018_vm1, %v2006_v17 }
 0x211   : > { %v1974_v19 = vpop.f32.mrf.mxu1 }
 0x212   : > { %v1975_v20 = vadd.f32 %v1974_v19, %v1846_v18 }
 0x214   : > { %v2007_v21 = vmax.f32 %v1975_v20, 0.0 }
 0x216   : > { %2024 = vst.msk [vmem:[%s3264_s6 + $0x28] sm:$0xff] %vm2018_vm1, %v2007_v21 }
 0x23f   : > { %v1987_v23 = vpop.f32.mrf.mxu2 }
 0x240   : > { %v1988_v24 = vadd.f32 %v1987_v23, %v1851_v22 }
 0x242   : > { %v2012_v27 = vmax.f32 %v1988_v24, 0.0 }
 0x244   : > { %2029 = vst.msk [vmem:[%s3264_s6 + $0x50] sm:$0xff] %vm2018_vm1, %v2012_v27 }
 0x247   : > { %v1989_v30 = vpop.f32.mrf.mxu2  ;;  %v1997_v31 = vpop.f32.mrf.mxu3 }
 0x248   : > { %v1990_v32 = vadd.f32 %v1989_v30, %v1852_v28  ;;  %v1998_v33 = vadd.f32 %v1997_v31, %v1855_v29 }
 0x24a   : > { %v2013_v34 = vmax.f32 %v1990_v32, 0.0  ;;  %v2016_v35 = vmax.f32 %v1998_v33, 0.0 }
 0x24c   : > { %2030 = vst.msk [vmem:[%s3264_s6 + $0x58] sm:$0xff] %vm2018_vm1, %v2013_v34 }
 0x24d   : > { %2033 = vst.msk [vmem:[%s3264_s6 + $0x70] sm:$0xff] %vm2018_vm1, %v2016_v35 }
 0x24f   : > { %v1999_v38 = vpop.f32.mrf.mxu3 }
 0x250   : > { %v2000_v39 = vadd.f32 %v1999_v38, %v1856_v36 }
 0x252   : > { %v2017_v40 = vmax.f32 %v2000_v39, 0.0 }
 0x254   : > { %2034 = vst.msk [vmem:[%s3264_s6 + $0x78] sm:$0xff] %vm2018_vm1, %v2017_v40 }
 0x260   : > { %v1967_v42 = vpop.f32.mrf.mxu0 }
 0x261   : > { %v1968_v43 = vadd.f32 %v1967_v42, %v1843_v41 }
 0x263   : > { %v2004_v44 = vmax.f32 %v1968_v43, 0.0 }
 0x265   : > { %2021 = vst.msk [vmem:[%s3264_s6 + $0x10] sm:$0xff] %vm2018_vm1, %v2004_v44 }
 0x268   : > { %v1969_v46 = vpop.f32.mrf.mxu0 }
 0x269   : > { %v1970_v47 = vadd.f32 %v1969_v46, %v1844_v45  ;;  %v1977_v48 = vpop.f32.mrf.mxu1 }
 0x26a   : > { %v1978_v49 = vadd.f32 %v1977_v48, %v1847_v37 }
 0x26b   : > { %v2005_v50 = vmax.f32 %v1970_v47, 0.0 }
 0x26c   : > { %v2008_v51 = vmax.f32 %v1978_v49, 0.0 }
 0x26d   : > { %2022 = vst.msk [vmem:[%s3264_s6 + $0x18] sm:$0xff] %vm2018_vm1, %v2005_v50 }
 0x26e   : > { %2025 = vst.msk [vmem:[%s3264_s6 + $0x30] sm:$0xff] %vm2018_vm1, %v2008_v51 }
 0x271   : > { %v1979_v53 = vpop.f32.mrf.mxu1 }
 0x272   : > { %v1980_v54 = vadd.f32 %v1979_v53, %v1848_v52 }
 0x274   : > { %v2009_v55 = vmax.f32 %v1980_v54, 0.0 }
 0x276   : > { %2026 = vst.msk [vmem:[%s3264_s6 + $0x38] sm:$0xff] %vm2018_vm1, %v2009_v55 }
 0x277 PF: > { %s13_s16 = sadd.s32 1, %s2476_s16   ;;  %s3340_s12 = smov %s2468_s14 }
 0x278   : > { %p10_p8 = scmp.ge.s32.totalorder %s13_s16, 6   ;;  %s3341_s13 = smov %s2472_s15 }
 0x279   : > { %s3342_s14 = smov %s3345_s17  ;;  %s3343_s15 = smov %s3349_s18 }
 0x27a   :  { %12 = sbr.rel (!%p10_p8) target bundleno = 3 (0x3), region = 67 }

</bundles_post_ra>
